<compile_context>
chip_gen: v7x
topology: tpu7x:2x2x1
jax: 0.10.0
libtpu: 0.0.40
codegen_flags: <defaults>
</compile_context>

<pallas_src>
import functools

import jax
import jax.numpy as jnp
from jax import lax
from jax.experimental import pallas as pl
from jax.experimental.pallas import tpu as pltpu

NEG_SLOPE = 0.2  # FFN LeakyReLU slope


def _leaky_relu(x):
    return jnp.where(x >= 0, x, NEG_SLOPE * x)


def _round_up(x, m):
    return ((x + m - 1) // m) * m


def _num_tensorcores():
    """TensorCores per chip: 2 on v7x, else 1 (v5e / v6e)."""
    try:
        kind = jax.devices()[0].device_kind.lower()
    except Exception:
        return 1
    if "v7" in kind or "7x" in kind:
        return 2
    return 1


# --------------------------------------------------------------------------
# Shared in-kernel helpers (all f32, MXU matmuls with f32 accumulation)
# --------------------------------------------------------------------------
def _pre_nn(x, w1, b1, w2, b2, w3, b3):
    h = _leaky_relu(jnp.dot(x, w1, preferred_element_type=jnp.float32) + b1)
    h = _leaky_relu(jnp.dot(h, w2, preferred_element_type=jnp.float32) + b2)
    return jnp.dot(h, w3, preferred_element_type=jnp.float32) + b3


def _post_nn(gsum, cond, w4g, w4c, b4, w5, b5, w6, b6):
    # hstack((gsum, cond)) @ W4  ==  gsum @ W4[:F] + cond @ W4[F:]
    g = _leaky_relu(jnp.dot(gsum, w4g, preferred_element_type=jnp.float32)
                    + jnp.dot(cond, w4c, preferred_element_type=jnp.float32) + b4)
    g = _leaky_relu(jnp.dot(g, w5, preferred_element_type=jnp.float32) + b5)
    return jnp.dot(g, w6, preferred_element_type=jnp.float32) + b6


def _pool_update(acc_ref, x, seg, row0, n_pts, w1, b1, w2, b2, w3, b3):
    """acc += one_hot(seg) @ pre_nn(x), with boundary-tile rows zero-masked."""
    ftx = _pre_nn(x, w1, b1, w2, b2, w3, b3)                       # (tile, F) f32
    tile = x.shape[0]
    # Rows at/after n_pts come from out-of-bounds boundary-block reads (garbage,
    # possibly NaN/Inf) -> zero them so they cannot contribute to the pool.
    valid = (row0 + lax.broadcasted_iota(jnp.int32, (tile, 1), 0)) < n_pts
    ftx = jnp.where(valid, ftx, 0.0)
    # global_add_pool as a lane-axis MXU contraction: (B_pad, tile) @ (tile, F).
    bpad = acc_ref.shape[0]
    onehot = (lax.broadcasted_iota(jnp.int32, (bpad, tile), 0) == seg)
    acc_ref[...] += jnp.dot(onehot.astype(jnp.float32), ftx,
                            preferred_element_type=jnp.float32)


# --------------------------------------------------------------------------
# Kernel A (v5e / v6e): fused pre_nn + pool + post_nn.  grid = (num_tiles,)
# --------------------------------------------------------------------------
def _fused_kernel(x_ref, seg_ref, w1_ref, b1_ref, w2_ref, b2_ref, w3_ref, b3_ref,
                  cond_ref, w4g_ref, w4c_ref, b4_ref, w5_ref, b5_ref,
                  w6_ref, b6_ref, out_ref, acc_ref, *, n_pts):
    i = pl.program_id(0)

    @pl.when(i == 0)
    def _():
        acc_ref[...] = jnp.zeros_like(acc_ref)

    tile = x_ref.shape[0]
    _pool_update(acc_ref, x_ref[...], seg_ref[...], i * tile, n_pts,
                 w1_ref[...], b1_ref[...], w2_ref[...], b2_ref[...],
                 w3_ref[...], b3_ref[...])

    @pl.when(i == pl.num_programs(0) - 1)
    def _():
        out = _post_nn(acc_ref[...], cond_ref[...],
                       w4g_ref[...], w4c_ref[...], b4_ref[...],
                       w5_ref[...], b5_ref[...], w6_ref[...], b6_ref[...])
        out_ref[...] = out.astype(out_ref.dtype)


# --------------------------------------------------------------------------
# Kernel B1 (v7x): per-split pre_nn + pool.  grid = (n_splits [parallel],
# tiles_per_split [arbitrary]) -> per-split partial gsum.
# --------------------------------------------------------------------------
def _pre_pool_kernel(x_ref, seg_ref, w1_ref, b1_ref, w2_ref, b2_ref,
                     w3_ref, b3_ref, psum_ref, acc_ref, *, tiles_per_split, n_pts):
    s = pl.program_id(0)
    i = pl.program_id(1)

    @pl.when(i == 0)
    def _():
        acc_ref[...] = jnp.zeros_like(acc_ref)

    tile = x_ref.shape[0]
    row0 = (s * tiles_per_split + i) * tile           # unclamped -> drives the mask
    _pool_update(acc_ref, x_ref[...], seg_ref[...], row0, n_pts,
                 w1_ref[...], b1_ref[...], w2_ref[...], b2_ref[...],
                 w3_ref[...], b3_ref[...])

    @pl.when(i == pl.num_programs(1) - 1)
    def _():
        psum_ref[...] = acc_ref[...]


# --------------------------------------------------------------------------
# Kernel B2 (v7x): reduce per-split partials + post_nn (tiny, runs once).
# --------------------------------------------------------------------------
def _reduce_post_kernel(psum_ref, cond_ref, w4g_ref, w4c_ref, b4_ref,
                        w5_ref, b5_ref, w6_ref, b6_ref, out_ref):
    gsum = jnp.sum(psum_ref[...], axis=0)
    out = _post_nn(gsum, cond_ref[...], w4g_ref[...], w4c_ref[...], b4_ref[...],
                   w5_ref[...], b5_ref[...], w6_ref[...], b6_ref[...])
    out_ref[...] = out.astype(out_ref.dtype)


# --------------------------------------------------------------------------
# Wrapper
# --------------------------------------------------------------------------
def dyn_hlvs_layer(x, cond, batch_idx, params, *, n_global, batch_size,
                   max_tile_n=8192, num_tensorcores=None):
    """x: (N, n_features) f32, cond: (batch_size, n_cond) f32,
       batch_idx: (N,) int32 graph assignment in [0, batch_size)."""
    if n_global == 0:
        return jnp.empty((batch_size, n_global), dtype=jnp.float32)

    x = x.astype(jnp.float32)
    cond = cond.astype(jnp.float32)
    n_pts, n_feat = x.shape
    n_cond = cond.shape[1]
    hidden = params["w1"].shape[1]

    b_pad = _round_up(max(batch_size, 1), 8)          # sublane-padded batch rows
    g_pad = _round_up(max(n_global, 1), 128)          # lane-dense output slab

    # ---- adaptive N tiling (tile_n multiple of 128, padding waste kept small) ----
    grain = 128
    max_tile_n = max(grain, (max_tile_n // grain) * grain)
    total_grains = pl.cdiv(max(n_pts, 1), grain)

    if num_tensorcores is None:
        num_tensorcores = _num_tensorcores()
    n_splits = 2 if (num_tensorcores >= 2 and total_grains >= 2) else 1

    grains_per_split = pl.cdiv(total_grains, n_splits)
    tiles_per_split = pl.cdiv(grains_per_split, max_tile_n // grain)
    grains_per_tile = pl.cdiv(grains_per_split, tiles_per_split)
    tile_n = grains_per_tile * grain
    num_blocks = max(1, pl.cdiv(n_pts, tile_n))       # real x blocks of size tile_n

    # ---- tiny wrapper-side prep (no pad/cast pass over x) ----
    seg = batch_idx.astype(jnp.int32).reshape(1, n_pts)            # points on lanes
    cond_p = jnp.pad(cond, ((0, b_pad - batch_size), (0, 0)))
    w1, b1 = params["w1"], params["b1"]
    w2, b2 = params["w2"], params["b2"]
    w3, b3 = params["w3"], params["b3"]
    w4g, w4c, b4 = params["w4g"], params["w4c"], params["b4"]
    w5, b5 = params["w5"], params["b5"]
    w6 = jnp.pad(params["w6"], ((0, 0), (0, g_pad - n_global)))
    b6 = jnp.pad(params["b6"], ((0, 0), (0, g_pad - n_global)))

    def const_spec(a):
        nd = a.ndim
        return pl.BlockSpec(a.shape, lambda *_: (0,) * nd)

    # Clamp the block index so a (rare) fully-padded tile re-reads the last real
    # block instead of issuing an out-of-bounds DMA; its rows are masked in-kernel.
    def tile_idx(t):
        return jnp.minimum(t, num_blocks - 1)

    n_cover = n_splits * tiles_per_split * tile_n
    flops = (2 * n_cover * (n_feat * hidden + hidden * hidden + hidden * n_feat
                            + b_pad * n_feat)
             + 2 * b_pad * ((n_feat + n_cond) * hidden + hidden * hidden
                            + hidden * g_pad))
    bytes_accessed = (n_pts * n_feat * 4 + n_pts * 4 + b_pad * n_cond * 4
                      + 4 * (n_feat * hidden + hidden * hidden + hidden * n_feat
                             + (n_feat + n_cond) * hidden + hidden * hidden
                             + hidden * g_pad)
                      + b_pad * g_pad * 4 + n_splits * b_pad * n_feat * 4)
    cost = pl.CostEstimate(flops=int(flops), transcendentals=0,
                           bytes_accessed=int(bytes_accessed))

    if n_splits == 1:
        # ---- single-TensorCore path: one fused kernel, post_nn on the last step ----
        x_spec = pl.BlockSpec((tile_n, n_feat), lambda i: (tile_idx(i), 0))
        seg_spec = pl.BlockSpec((1, tile_n), lambda i: (0, tile_idx(i)))
        out_full = pl.pallas_call(
            functools.partial(_fused_kernel, n_pts=n_pts),
            out_shape=jax.ShapeDtypeStruct((b_pad, g_pad), jnp.float32),
            grid_spec=pltpu.PrefetchScalarGridSpec(
                num_scalar_prefetch=0,
                grid=(tiles_per_split,),
                in_specs=[x_spec, seg_spec] + [const_spec(a) for a in
                          (w1, b1, w2, b2, w3, b3, cond_p,
                           w4g, w4c, b4, w5, b5, w6, b6)],
                out_specs=pl.BlockSpec((b_pad, g_pad), lambda i: (0, 0)),
                scratch_shapes=[pltpu.VMEM((b_pad, n_feat), jnp.float32)]),
            compiler_params=pltpu.CompilerParams(
                dimension_semantics=("arbitrary",)),
            cost_estimate=cost,
        )(x, seg, w1, b1, w2, b2, w3, b3, cond_p, w4g, w4c, b4, w5, b5, w6, b6)
    else:
        # ---- dual-TensorCore (v7x) path: 2-way parallel split + tiny reduce ----
        x_spec = pl.BlockSpec(
            (tile_n, n_feat), lambda s, i: (tile_idx(s * tiles_per_split + i), 0))
        seg_spec = pl.BlockSpec(
            (1, tile_n), lambda s, i: (0, tile_idx(s * tiles_per_split + i)))
        psum = pl.pallas_call(
            functools.partial(_pre_pool_kernel,
                              tiles_per_split=tiles_per_split, n_pts=n_pts),
            out_shape=jax.ShapeDtypeStruct((n_splits, b_pad, n_feat), jnp.float32),
            grid_spec=pltpu.PrefetchScalarGridSpec(
                num_scalar_prefetch=0,
                grid=(n_splits, tiles_per_split),
                in_specs=[x_spec, seg_spec] + [const_spec(a) for a in
                          (w1, b1, w2, b2, w3, b3)],
                out_specs=pl.BlockSpec((None, b_pad, n_feat), lambda s, i: (s, 0, 0)),
                scratch_shapes=[pltpu.VMEM((b_pad, n_feat), jnp.float32)]),
            compiler_params=pltpu.CompilerParams(
                dimension_semantics=("parallel", "arbitrary")),
            cost_estimate=cost,
        )(x, seg, w1, b1, w2, b2, w3, b3)

        vmem = pl.BlockSpec(memory_space=pltpu.MemorySpace.VMEM)
        out_full = pl.pallas_call(
            _reduce_post_kernel,
            out_shape=jax.ShapeDtypeStruct((b_pad, g_pad), jnp.float32),
            in_specs=[vmem] * 9,
            out_specs=vmem,
        )(psum, cond_p, w4g, w4c, b4, w5, b5, w6, b6)

    return out_full[:batch_size, :n_global]


# --------------------------------------------------------------------------
# Synthetic weights + pure-JAX reference
# --------------------------------------------------------------------------
def init_params(key, n_features, n_cond, n_global, hidden):
    ks = jax.random.split(key, 12)

    def lin(kw, kb, fan_in, fan_out):
        bound = 1.0 / jnp.sqrt(fan_in)
        w = jax.random.uniform(kw, (fan_in, fan_out), jnp.float32, -bound, bound)
        b = jax.random.uniform(kb, (1, fan_out), jnp.float32, -bound, bound)
        return w, b

    w1, b1 = lin(ks[0], ks[1], n_features, hidden)
    w2, b2 = lin(ks[2], ks[3], hidden, hidden)
    w3, b3 = lin(ks[4], ks[5], hidden, n_features)
    w4, b4 = lin(ks[6], ks[7], n_features + n_cond, hidden)
    w5, b5 = lin(ks[8], ks[9], hidden, hidden)
    w6, b6 = lin(ks[10], ks[11], hidden, n_global)
    return {
        "w1": w1, "b1": b1, "w2": w2, "b2": b2, "w3": w3, "b3": b3,
        "w4g": w4[:n_features], "w4c": w4[n_features:], "b4": b4,
        "w5": w5, "b5": b5, "w6": w6, "b6": b6,
    }


def reference_f32(x, cond, batch_idx, params, *, n_global, batch_size):
    """Mirrors the PyTorch forward in f32."""
    h = _leaky_relu(x @ params["w1"] + params["b1"])
    h = _leaky_relu(h @ params["w2"] + params["b2"])
    ftx = h @ params["w3"] + params["b3"]
    gsum = jax.ops.segment_sum(ftx, batch_idx, num_segments=batch_size)
    z = jnp.hstack((gsum, cond))
    w4 = jnp.concatenate([params["w4g"], params["w4c"]], axis=0)
    g = _leaky_relu(z @ w4 + params["b4"])
    g = _leaky_relu(g @ params["w5"] + params["b5"])
    return (g @ params["w6"] + params["b6"]).reshape(batch_size, n_global)


if __name__ == "__main__":
    n_features, n_cond, n_global = 16, 4, 8
    batch_size, hidden = 2, 32
    n_points = 300  # not a multiple of 128 -> exercises the ragged-tail masking

    key = jax.random.PRNGKey(0)
    k_x, k_c, k_p = jax.random.split(key, 3)

    x = jax.random.normal(k_x, (n_points, n_features), jnp.float32)
    cond = jax.random.normal(k_c, (batch_size, n_cond), jnp.float32)
    batch_idx = (jnp.arange(n_points) * batch_size // n_points).astype(jnp.int32)

    params = init_params(k_p, n_features, n_cond, n_global, hidden)
    ref = reference_f32(x, cond, batch_idx, params,
                        n_global=n_global, batch_size=batch_size)

    # 1) default chip-aware path
    out = jax.block_until_ready(
        dyn_hlvs_layer(x, cond, batch_idx, params,
                       n_global=n_global, batch_size=batch_size))
    assert out.shape == (batch_size, n_global)
    assert jnp.allclose(out, ref, atol=5e-2, rtol=5e-2), "mismatch (default path)"

    # 2) multi-tile fused path (forces >1 grid step + accumulator + tail mask)
    out2 = jax.block_until_ready(
        dyn_hlvs_layer(x, cond, batch_idx, params, n_global=n_global,
                       batch_size=batch_size, max_tile_n=128, num_tensorcores=1))
    assert jnp.allclose(out2, ref, atol=5e-2, rtol=5e-2), "mismatch (fused path)"

    # 3) dual-TensorCore split path (functionally valid on any chip)
    out3 = jax.block_until_ready(
        dyn_hlvs_layer(x, cond, batch_idx, params, n_global=n_global,
                       batch_size=batch_size, max_tile_n=128, num_tensorcores=2))
    assert jnp.allclose(out3, ref, atol=5e-2, rtol=5e-2), "mismatch (split path)"

    print("KERNEL_OK")
</pallas_src>

<mosaic_0001>
module attributes {stable_mosaic.version = 11 : i64} {
  func.func @_fused_kernel(%arg0: i32, %arg1: memref<384x16xf32, #tpu.memory_space<vmem>>, %arg2: memref<1x384xi32, #tpu.memory_space<vmem>>, %arg3: memref<16x32xf32, #tpu.memory_space<vmem>>, %arg4: memref<1x32xf32, #tpu.memory_space<vmem>>, %arg5: memref<32x32xf32, #tpu.memory_space<vmem>>, %arg6: memref<1x32xf32, #tpu.memory_space<vmem>>, %arg7: memref<32x16xf32, #tpu.memory_space<vmem>>, %arg8: memref<1x16xf32, #tpu.memory_space<vmem>>, %arg9: memref<8x4xf32, #tpu.memory_space<vmem>>, %arg10: memref<16x32xf32, #tpu.memory_space<vmem>>, %arg11: memref<4x32xf32, #tpu.memory_space<vmem>>, %arg12: memref<1x32xf32, #tpu.memory_space<vmem>>, %arg13: memref<32x32xf32, #tpu.memory_space<vmem>>, %arg14: memref<1x32xf32, #tpu.memory_space<vmem>>, %arg15: memref<32x128xf32, #tpu.memory_space<vmem>>, %arg16: memref<1x128xf32, #tpu.memory_space<vmem>>, %arg17: memref<8x128xf32, #tpu.memory_space<vmem>>, %arg18: memref<8x16xf32, #tpu.memory_space<vmem>>) attributes {dimension_semantics = [#tpu.dimension_semantics<arbitrary>], iteration_bounds = array<i64: 1>, scalar_prefetch = 0 : i64, scratch_operands = 1 : i64, tpu.core_type = #tpu.core_type<tc>, window_params = [{transform_indices = @transform_0, window_bounds = array<i64: 384, 16>}, {transform_indices = @transform_1, window_bounds = array<i64: 1, 384>}, {pipeline_mode = #tpu.pipeline_mode<synchronous>, transform_indices = @transform_2, window_bounds = array<i64: 16, 32>}, {pipeline_mode = #tpu.pipeline_mode<synchronous>, transform_indices = @transform_3, window_bounds = array<i64: 1, 32>}, {pipeline_mode = #tpu.pipeline_mode<synchronous>, transform_indices = @transform_4, window_bounds = array<i64: 32, 32>}, {pipeline_mode = #tpu.pipeline_mode<synchronous>, transform_indices = @transform_5, window_bounds = array<i64: 1, 32>}, {pipeline_mode = #tpu.pipeline_mode<synchronous>, transform_indices = @transform_6, window_bounds = array<i64: 32, 16>}, {pipeline_mode = #tpu.pipeline_mode<synchronous>, transform_indices = @transform_7, window_bounds = array<i64: 1, 16>}, {pipeline_mode = #tpu.pipeline_mode<synchronous>, transform_indices = @transform_8, window_bounds = array<i64: 8, 4>}, {pipeline_mode = #tpu.pipeline_mode<synchronous>, transform_indices = @transform_9, window_bounds = array<i64: 16, 32>}, {pipeline_mode = #tpu.pipeline_mode<synchronous>, transform_indices = @transform_10, window_bounds = array<i64: 4, 32>}, {pipeline_mode = #tpu.pipeline_mode<synchronous>, transform_indices = @transform_11, window_bounds = array<i64: 1, 32>}, {pipeline_mode = #tpu.pipeline_mode<synchronous>, transform_indices = @transform_12, window_bounds = array<i64: 32, 32>}, {pipeline_mode = #tpu.pipeline_mode<synchronous>, transform_indices = @transform_13, window_bounds = array<i64: 1, 32>}, {pipeline_mode = #tpu.pipeline_mode<synchronous>, transform_indices = @transform_14, window_bounds = array<i64: 32, 128>}, {pipeline_mode = #tpu.pipeline_mode<synchronous>, transform_indices = @transform_15, window_bounds = array<i64: 1, 128>}, {pipeline_mode = #tpu.pipeline_mode<synchronous>, transform_indices = @transform_16, window_bounds = array<i64: 8, 128>}]} {
    %c0_i32 = arith.constant 0 : i32
    %0 = arith.cmpi eq, %arg0, %c0_i32 : i32
    %1 = arith.extui %0 : i1 to i32
    %c0_i32_0 = arith.constant 0 : i32
    %2 = arith.cmpi ne, %1, %c0_i32_0 : i32
    scf.if %2 {
      %cst_30 = arith.constant 0.000000e+00 : f32
      %52 = vector.broadcast %cst_30 : f32 to vector<8x16xf32>
      %c0_31 = arith.constant 0 : index
      %c0_32 = arith.constant 0 : index
      %53 = vector.load %arg18[%c0_31, %c0_32] : memref<8x16xf32, #tpu.memory_space<vmem>>, vector<8x16xf32>
      tpu.vector_store %arg18[%c0_31, %c0_32], %52 {strides = array<i32>} : memref<8x16xf32, #tpu.memory_space<vmem>>, vector<8x16xf32>,
    } else {
    }
    %c0 = arith.constant 0 : index
    %c0_1 = arith.constant 0 : index
    %3 = vector.load %arg1[%c0, %c0_1] : memref<384x16xf32, #tpu.memory_space<vmem>>, vector<384x16xf32>
    %c0_2 = arith.constant 0 : index
    %c0_3 = arith.constant 0 : index
    %4 = vector.load %arg2[%c0_2, %c0_3] : memref<1x384xi32, #tpu.memory_space<vmem>>, vector<1x384xi32>
    %c384_i32 = arith.constant 384 : i32
    %5 = arith.muli %arg0, %c384_i32 : i32
    %c0_4 = arith.constant 0 : index
    %c0_5 = arith.constant 0 : index
    %6 = vector.load %arg3[%c0_4, %c0_5] : memref<16x32xf32, #tpu.memory_space<vmem>>, vector<16x32xf32>
    %c0_6 = arith.constant 0 : index
    %c0_7 = arith.constant 0 : index
    %7 = vector.load %arg4[%c0_6, %c0_7] : memref<1x32xf32, #tpu.memory_space<vmem>>, vector<1x32xf32>
    %c0_8 = arith.constant 0 : index
    %c0_9 = arith.constant 0 : index
    %8 = vector.load %arg5[%c0_8, %c0_9] : memref<32x32xf32, #tpu.memory_space<vmem>>, vector<32x32xf32>
    %c0_10 = arith.constant 0 : index
    %c0_11 = arith.constant 0 : index
    %9 = vector.load %arg6[%c0_10, %c0_11] : memref<1x32xf32, #tpu.memory_space<vmem>>, vector<1x32xf32>
    %c0_12 = arith.constant 0 : index
    %c0_13 = arith.constant 0 : index
    %10 = vector.load %arg7[%c0_12, %c0_13] : memref<32x16xf32, #tpu.memory_space<vmem>>, vector<32x16xf32>
    %c0_14 = arith.constant 0 : index
    %c0_15 = arith.constant 0 : index
    %11 = vector.load %arg8[%c0_14, %c0_15] : memref<1x16xf32, #tpu.memory_space<vmem>>, vector<1x16xf32>
    %cst = arith.constant dense<0.000000e+00> : vector<384x32xf32>
    %12 = tpu.matmul %3, %6, %cst {dimension_numbers = #tpu.dot_dimension_numbers<[1], [0], [0], [1], [0, 0, 1, 1], [], []>} : vector<384x16xf32>, vector<16x32xf32>, vector<384x32xf32> -> vector<384x32xf32>
    %13 = vector.broadcast %7 : vector<1x32xf32> to vector<384x32xf32>
    %14 = arith.addf %12, %13 : vector<384x32xf32>
    %cst_16 = arith.constant 0.000000e+00 : f32
    %15 = vector.broadcast %cst_16 : f32 to vector<384x32xf32>
    %16 = arith.cmpf oge, %14, %15 : vector<384x32xf32>
    %cst_17 = arith.constant 2.000000e-01 : f32
    %17 = vector.broadcast %cst_17 : f32 to vector<384x32xf32>
    %18 = arith.mulf %17, %14 : vector<384x32xf32>
    %19 = arith.select %16, %14, %18 : vector<384x32xi1>, vector<384x32xf32>
    %cst_18 = arith.constant dense<0.000000e+00> : vector<384x32xf32>
    %20 = tpu.matmul %19, %8, %cst_18 {dimension_numbers = #tpu.dot_dimension_numbers<[1], [0], [0], [1], [0, 0, 1, 1], [], []>} : vector<384x32xf32>, vector<32x32xf32>, vector<384x32xf32> -> vector<384x32xf32>
    %21 = vector.broadcast %9 : vector<1x32xf32> to vector<384x32xf32>
    %22 = arith.addf %20, %21 : vector<384x32xf32>
    %cst_19 = arith.constant 0.000000e+00 : f32
    %23 = vector.broadcast %cst_19 : f32 to vector<384x32xf32>
    %24 = arith.cmpf oge, %22, %23 : vector<384x32xf32>
    %cst_20 = arith.constant 2.000000e-01 : f32
    %25 = vector.broadcast %cst_20 : f32 to vector<384x32xf32>
    %26 = arith.mulf %25, %22 : vector<384x32xf32>
    %27 = arith.select %24, %22, %26 : vector<384x32xi1>, vector<384x32xf32>
    %cst_21 = arith.constant dense<0.000000e+00> : vector<384x16xf32>
    %28 = tpu.matmul %27, %10, %cst_21 {dimension_numbers = #tpu.dot_dimension_numbers<[1], [0], [0], [1], [0, 0, 1, 1], [], []>} : vector<384x32xf32>, vector<32x16xf32>, vector<384x16xf32> -> vector<384x16xf32>
    %29 = vector.broadcast %11 : vector<1x16xf32> to vector<384x16xf32>
    %30 = arith.addf %28, %29 : vector<384x16xf32>
    %31 = tpu.iota {dimensions = array<i32: 0>} : vector<384x1xi32>
    %32 = vector.broadcast %5 : i32 to vector<384x1xi32>
    %33 = arith.addi %32, %31 : vector<384x1xi32>
    %c300_i32 = arith.constant 300 : i32
    %34 = vector.broadcast %c300_i32 : i32 to vector<384x1xi32>
    %35 = arith.cmpi slt, %33, %34 : vector<384x1xi32>
    %cst_22 = arith.constant 0.000000e+00 : f32
    %36 = vector.shape_cast %35 : vector<384x1xi1> to vector<384x1xi1>
    %37 = vector.broadcast %36 : vector<384x1xi1> to vector<384x16xi1>
    %38 = vector.broadcast %cst_22 : f32 to vector<384x16xf32>
    %39 = arith.select %37, %30, %38 : vector<384x16xi1>, vector<384x16xf32>
    %40 = tpu.iota {dimensions = array<i32: 0>} : vector<8x384xi32>
    %41 = vector.broadcast %4 : vector<1x384xi32> to vector<8x384xi32>
    %42 = arith.cmpi eq, %40, %41 : vector<8x384xi32>
    %c0_23 = arith.constant 0 : index
    %c0_24 = arith.constant 0 : index
    %43 = vector.load %arg18[%c0_23, %c0_24] : memref<8x16xf32, #tpu.memory_space<vmem>>, vector<8x16xf32>
    %44 = arith.extui %42 : vector<8x384xi1> to vector<8x384xi32>
    %45 = arith.sitofp %44 : vector<8x384xi32> to vector<8x384xf32>
    %cst_25 = arith.constant dense<0.000000e+00> : vector<8x16xf32>
    %46 = tpu.matmul %45, %39, %cst_25 {dimension_numbers = #tpu.dot_dimension_numbers<[1], [0], [0], [1], [0, 0, 1, 1], [], []>} : vector<8x384xf32>, vector<384x16xf32>, vector<8x16xf32> -> vector<8x16xf32>
    %47 = arith.addf %43, %46 : vector<8x16xf32>
    %c0_26 = arith.constant 0 : index
    %c0_27 = arith.constant 0 : index
    %48 = vector.load %arg18[%c0_26, %c0_27] : memref<8x16xf32, #tpu.memory_space<vmem>>, vector<8x16xf32>
    tpu.vector_store %arg18[%c0_26, %c0_27], %47 {strides = array<i32>} : memref<8x16xf32, #tpu.memory_space<vmem>>, vector<8x16xf32>,
    %c0_i32_28 = arith.constant 0 : i32
    %49 = arith.cmpi eq, %arg0, %c0_i32_28 : i32
    %50 = arith.extui %49 : i1 to i32
    %c0_i32_29 = arith.constant 0 : i32
    %51 = arith.cmpi ne, %50, %c0_i32_29 : i32
    scf.if %51 {
      %c0_30 = arith.constant 0 : index
      %c0_31 = arith.constant 0 : index
      %52 = vector.load %arg18[%c0_30, %c0_31] : memref<8x16xf32, #tpu.memory_space<vmem>>, vector<8x16xf32>
      %c0_32 = arith.constant 0 : index
      %c0_33 = arith.constant 0 : index
      %53 = vector.load %arg9[%c0_32, %c0_33] : memref<8x4xf32, #tpu.memory_space<vmem>>, vector<8x4xf32>
      %c0_34 = arith.constant 0 : index
      %c0_35 = arith.constant 0 : index
      %54 = vector.load %arg10[%c0_34, %c0_35] : memref<16x32xf32, #tpu.memory_space<vmem>>, vector<16x32xf32>
      %c0_36 = arith.constant 0 : index
      %c0_37 = arith.constant 0 : index
      %55 = vector.load %arg11[%c0_36, %c0_37] : memref<4x32xf32, #tpu.memory_space<vmem>>, vector<4x32xf32>
      %c0_38 = arith.constant 0 : index
      %c0_39 = arith.constant 0 : index
      %56 = vector.load %arg12[%c0_38, %c0_39] : memref<1x32xf32, #tpu.memory_space<vmem>>, vector<1x32xf32>
      %c0_40 = arith.constant 0 : index
      %c0_41 = arith.constant 0 : index
      %57 = vector.load %arg13[%c0_40, %c0_41] : memref<32x32xf32, #tpu.memory_space<vmem>>, vector<32x32xf32>
      %c0_42 = arith.constant 0 : index
      %c0_43 = arith.constant 0 : index
      %58 = vector.load %arg14[%c0_42, %c0_43] : memref<1x32xf32, #tpu.memory_space<vmem>>, vector<1x32xf32>
      %c0_44 = arith.constant 0 : index
      %c0_45 = arith.constant 0 : index
      %59 = vector.load %arg15[%c0_44, %c0_45] : memref<32x128xf32, #tpu.memory_space<vmem>>, vector<32x128xf32>
      %c0_46 = arith.constant 0 : index
      %c0_47 = arith.constant 0 : index
      %60 = vector.load %arg16[%c0_46, %c0_47] : memref<1x128xf32, #tpu.memory_space<vmem>>, vector<1x128xf32>
      %cst_48 = arith.constant dense<0.000000e+00> : vector<8x32xf32>
      %61 = tpu.matmul %52, %54, %cst_48 {dimension_numbers = #tpu.dot_dimension_numbers<[1], [0], [0], [1], [0, 0, 1, 1], [], []>} : vector<8x16xf32>, vector<16x32xf32>, vector<8x32xf32> -> vector<8x32xf32>
      %cst_49 = arith.constant dense<0.000000e+00> : vector<8x32xf32>
      %62 = tpu.matmul %53, %55, %cst_49 {dimension_numbers = #tpu.dot_dimension_numbers<[1], [0], [0], [1], [0, 0, 1, 1], [], []>} : vector<8x4xf32>, vector<4x32xf32>, vector<8x32xf32> -> vector<8x32xf32>
      %63 = arith.addf %61, %62 : vector<8x32xf32>
      %64 = vector.broadcast %56 : vector<1x32xf32> to vector<8x32xf32>
      %65 = arith.addf %63, %64 : vector<8x32xf32>
      %cst_50 = arith.constant 0.000000e+00 : f32
      %66 = vector.broadcast %cst_50 : f32 to vector<8x32xf32>
      %67 = arith.cmpf oge, %65, %66 : vector<8x32xf32>
      %cst_51 = arith.constant 2.000000e-01 : f32
      %68 = vector.broadcast %cst_51 : f32 to vector<8x32xf32>
      %69 = arith.mulf %68, %65 : vector<8x32xf32>
      %70 = arith.select %67, %65, %69 : vector<8x32xi1>, vector<8x32xf32>
      %cst_52 = arith.constant dense<0.000000e+00> : vector<8x32xf32>
      %71 = tpu.matmul %70, %57, %cst_52 {dimension_numbers = #tpu.dot_dimension_numbers<[1], [0], [0], [1], [0, 0, 1, 1], [], []>} : vector<8x32xf32>, vector<32x32xf32>, vector<8x32xf32> -> vector<8x32xf32>
      %72 = vector.broadcast %58 : vector<1x32xf32> to vector<8x32xf32>
      %73 = arith.addf %71, %72 : vector<8x32xf32>
      %cst_53 = arith.constant 0.000000e+00 : f32
      %74 = vector.broadcast %cst_53 : f32 to vector<8x32xf32>
      %75 = arith.cmpf oge, %73, %74 : vector<8x32xf32>
      %cst_54 = arith.constant 2.000000e-01 : f32
      %76 = vector.broadcast %cst_54 : f32 to vector<8x32xf32>
      %77 = arith.mulf %76, %73 : vector<8x32xf32>
      %78 = arith.select %75, %73, %77 : vector<8x32xi1>, vector<8x32xf32>
      %cst_55 = arith.constant dense<0.000000e+00> : vector<8x128xf32>
      %79 = tpu.matmul %78, %59, %cst_55 {dimension_numbers = #tpu.dot_dimension_numbers<[1], [0], [0], [1], [0, 0, 1, 1], [], []>} : vector<8x32xf32>, vector<32x128xf32>, vector<8x128xf32> -> vector<8x128xf32>
      %80 = vector.broadcast %60 : vector<1x128xf32> to vector<8x128xf32>
      %81 = arith.addf %79, %80 : vector<8x128xf32>
      %c0_56 = arith.constant 0 : index
      %c0_57 = arith.constant 0 : index
      %82 = vector.load %arg17[%c0_56, %c0_57] : memref<8x128xf32, #tpu.memory_space<vmem>>, vector<8x128xf32>
      tpu.vector_store %arg17[%c0_56, %c0_57], %81 {strides = array<i32>} : memref<8x128xf32, #tpu.memory_space<vmem>>, vector<8x128xf32>,
    } else {
    }
    return
  }
  func.func @transform_0(%arg0: i32) -> (i32, i32) {
    %c0_i32 = arith.constant 0 : i32
    %0 = arith.minsi %arg0, %c0_i32 : i32
    %c0_i32_0 = arith.constant 0 : i32
    %c0_i32_1 = arith.constant 0 : i32
    return %0, %c0_i32_0 : i32, i32
  }
  func.func @transform_1(%arg0: i32) -> (i32, i32) {
    %c0_i32 = arith.constant 0 : i32
    %0 = arith.minsi %arg0, %c0_i32 : i32
    %c0_i32_0 = arith.constant 0 : i32
    %c0_i32_1 = arith.constant 0 : i32
    return %c0_i32_0, %0 : i32, i32
  }
  func.func @transform_2(%arg0: i32) -> (i32, i32) {
    %c0_i32 = arith.constant 0 : i32
    %c0_i32_0 = arith.constant 0 : i32
    %c0_i32_1 = arith.constant 0 : i32
    return %c0_i32, %c0_i32_0 : i32, i32
  }
  func.func @transform_3(%arg0: i32) -> (i32, i32) {
    %c0_i32 = arith.constant 0 : i32
    %c0_i32_0 = arith.constant 0 : i32
    %c0_i32_1 = arith.constant 0 : i32
    return %c0_i32, %c0_i32_0 : i32, i32
  }
  func.func @transform_4(%arg0: i32) -> (i32, i32) {
    %c0_i32 = arith.constant 0 : i32
    %c0_i32_0 = arith.constant 0 : i32
    %c0_i32_1 = arith.constant 0 : i32
    return %c0_i32, %c0_i32_0 : i32, i32
  }
  func.func @transform_5(%arg0: i32) -> (i32, i32) {
    %c0_i32 = arith.constant 0 : i32
    %c0_i32_0 = arith.constant 0 : i32
    %c0_i32_1 = arith.constant 0 : i32
    return %c0_i32, %c0_i32_0 : i32, i32
  }
  func.func @transform_6(%arg0: i32) -> (i32, i32) {
    %c0_i32 = arith.constant 0 : i32
    %c0_i32_0 = arith.constant 0 : i32
    %c0_i32_1 = arith.constant 0 : i32
    return %c0_i32, %c0_i32_0 : i32, i32
  }
  func.func @transform_7(%arg0: i32) -> (i32, i32) {
    %c0_i32 = arith.constant 0 : i32
    %c0_i32_0 = arith.constant 0 : i32
    %c0_i32_1 = arith.constant 0 : i32
    return %c0_i32, %c0_i32_0 : i32, i32
  }
  func.func @transform_8(%arg0: i32) -> (i32, i32) {
    %c0_i32 = arith.constant 0 : i32
    %c0_i32_0 = arith.constant 0 : i32
    %c0_i32_1 = arith.constant 0 : i32
    return %c0_i32, %c0_i32_0 : i32, i32
  }
  func.func @transform_9(%arg0: i32) -> (i32, i32) {
    %c0_i32 = arith.constant 0 : i32
    %c0_i32_0 = arith.constant 0 : i32
    %c0_i32_1 = arith.constant 0 : i32
    return %c0_i32, %c0_i32_0 : i32, i32
  }
  func.func @transform_10(%arg0: i32) -> (i32, i32) {
    %c0_i32 = arith.constant 0 : i32
    %c0_i32_0 = arith.constant 0 : i32
    %c0_i32_1 = arith.constant 0 : i32
    return %c0_i32, %c0_i32_0 : i32, i32
  }
  func.func @transform_11(%arg0: i32) -> (i32, i32) {
    %c0_i32 = arith.constant 0 : i32
    %c0_i32_0 = arith.constant 0 : i32
    %c0_i32_1 = arith.constant 0 : i32
    return %c0_i32, %c0_i32_0 : i32, i32
  }
  func.func @transform_12(%arg0: i32) -> (i32, i32) {
    %c0_i32 = arith.constant 0 : i32
    %c0_i32_0 = arith.constant 0 : i32
    %c0_i32_1 = arith.constant 0 : i32
    return %c0_i32, %c0_i32_0 : i32, i32
  }
  func.func @transform_13(%arg0: i32) -> (i32, i32) {
    %c0_i32 = arith.constant 0 : i32
    %c0_i32_0 = arith.constant 0 : i32
    %c0_i32_1 = arith.constant 0 : i32
    return %c0_i32, %c0_i32_0 : i32, i32
  }
  func.func @transform_14(%arg0: i32) -> (i32, i32) {
    %c0_i32 = arith.constant 0 : i32
    %c0_i32_0 = arith.constant 0 : i32
    %c0_i32_1 = arith.constant 0 : i32
    return %c0_i32, %c0_i32_0 : i32, i32
  }
  func.func @transform_15(%arg0: i32) -> (i32, i32) {
    %c0_i32 = arith.constant 0 : i32
    %c0_i32_0 = arith.constant 0 : i32
    %c0_i32_1 = arith.constant 0 : i32
    return %c0_i32, %c0_i32_0 : i32, i32
  }
  func.func @transform_16(%arg0: i32) -> (i32, i32) {
    %c0_i32 = arith.constant 0 : i32
    %c0_i32_0 = arith.constant 0 : i32
    %c0_i32_1 = arith.constant 0 : i32
    return %c0_i32, %c0_i32_0 : i32, i32
  }
}

</mosaic_0001>

<bundles_post_ra>
// kernel: tpu_custom_call.1
= control target key start
LH: loop header
LB: loop body
LE: loop exit
PB: predicated region body
PF: predicated region fallthrough
CT: control target
= control target key end

     0   :  { %s4067_s0 = inlined_call_operand.vmem [shape: f32[300,16], index: 0, kind: input, shape index: {}]   ;;  %s4068_s1 = inlined_call_operand.vmem [shape: s32[1,300], index: 1, kind: input, shape index: {}]   ;;  %s4069_s2 = inlined_call_operand.vmem [shape: f32[16,32], index: 2, kind: input, shape index: {}]   ;;  %s4070_s3 = inlined_call_operand.vmem [shape: f32[1,32], index: 3, kind: input, shape index: {}]   ;;  %s4071_s4 = inlined_call_operand.vmem [shape: f32[32,32], index: 4, kind: input, shape index: {}]   ;;  %s4072_s5 = inlined_call_operand.vmem [shape: f32[1,32], index: 5, kind: input, shape index: {}]   ;;  %s4073_s6 = inlined_call_operand.vmem [shape: f32[32,16], index: 6, kind: input, shape index: {}]   ;;  %s4074_s7 = inlined_call_operand.vmem [shape: f32[1,16], index: 7, kind: input, shape index: {}]   ;;  %s4075_s8 = inlined_call_operand.vmem [shape: f32[8,4], index: 8, kind: input, shape index: {}]   ;;  %s4076_s9 = inlined_call_operand.vmem [shape: f32[16,32], index: 9, kind: input, shape index: {}]   ;;  %s4077_s10 = inlined_call_operand.vmem [shape: f32[4,32], index: 10, kind: input, shape index: {}]   ;;  %s4078_s11 = inlined_call_operand.vmem [shape: f32[1,32], index: 11, kind: input, shape index: {}]   ;;  %s4079_s12 = inlined_call_operand.vmem [shape: f32[32,32], index: 12, kind: input, shape index: {}]   ;;  %s4080_s13 = inlined_call_operand.vmem [shape: f32[1,32], index: 13, kind: input, shape index: {}]   ;;  %s4081_s14 = inlined_call_operand.vmem [shape: f32[32,128], index: 14, kind: input, shape index: {}]   ;;  %s4082_s15 = inlined_call_operand.vmem [shape: f32[1,128], index: 15, kind: input, shape index: {}]   ;;  %s4083_s16 = inlined_call_operand.hbm [shape: f32[8,128], index: 16, kind: output, shape index: {}]  }
   0x1   :  { %4085 = sst [smem:[#allocation6_spill]] %s4067_s0 }
   0x2   :  { %v110_v0 = vld [vmem:[%s4069_s2] sm:$0xff]  ;;  %v111_v1 = vld [vmem:[%s4069_s2 + $0x8] sm:$0xff]  ;;  %vm58_vm0 = vcmask 130048   ;;  %s4086_s27 = sld [smem:[#allocation6_spill]] }
   0x3   :  { %v3246_v3 = vpack.c.bf16 %v111_v1, %v110_v0 }
   0x5   :  { %3247 = vmatprep.subr.bf16.mxu0 %v3246_v3  ;;  %3323 = vmatprep.subr.bf16.mxu1 %v3246_v3 }
   0x6   :  { %3249 = vmatpush3.bf16.msra.mxu0 %v3246_v3  ;;  %3324 = vmatpush3.bf16.msra.mxu1 %v3246_v3 }
   0x8   :  { %v60_v2 = vld [vmem:[%s4086_s27] sm:$0xff]  ;;  %v61_v4 = vld [vmem:[%s4086_s27 + $0x8] sm:$0xff]  ;;  %v62_v5 = vld [vmem:[%s4086_s27 + $0x10] sm:$0xff] }
   0x9   :  { %2965 = vmatprep.mubr.msk.f32.mxu0 %vm58_vm0, %v60_v2  ;;  %v63_v6 = vld [vmem:[%s4086_s27 + $0x18] sm:$0xff]  ;;  %v64_v7 = vld [vmem:[%s4086_s27 + $0x20] sm:$0xff]  ;;  %v65_v8 = vld [vmem:[%s4086_s27 + $0x28] sm:$0xff] }
   0xa   :  { %2966 = vmatmul.mubr.msk.f32.vlgmr.msra.gmra.mrb[0].mxu0 %vm58_vm0, %v61_v4  ;;  %v94_v9 = vld [vmem:[%s4086_s27 + $0x110] sm:$0xff]  ;;  %v95_v10 = vld [vmem:[%s4086_s27 + $0x118] sm:$0xff]  ;;  %v96_v11 = vld [vmem:[%s4086_s27 + $0x120] sm:$0xff] }
   0xb   :  { %2968 = vmatprep.mubr.msk.f32.mxu0 %vm58_vm0, %v62_v5  ;;  %v66_v12 = vld [vmem:[%s4086_s27 + $0x30] sm:$0xff]  ;;  %3016 = vmatprep.mubr.msk.f32.mxu1 %vm58_vm0, %v94_v9  ;;  %v97_v13 = vld [vmem:[%s4086_s27 + $0x128] sm:$0xff]  ;;  %v67_v14 = vld [vmem:[%s4086_s27 + $0x38] sm:$0xff] }
   0xc   :  { %3017 = vmatmul.mubr.msk.f32.vlgmr.msra.gmra.mrb[0].mxu1 %vm58_vm0, %v95_v10  ;;  %v98_v15 = vld [vmem:[%s4086_s27 + $0x130] sm:$0xff] }
   0xd   :  { %3019 = vmatprep.mubr.msk.f32.mxu1 %vm58_vm0, %v96_v11 }
   0xe   :  { %2969 = vmatmul.mubr.msk.f32.gmra.mrb[2].mxu0 %vm58_vm0, %v63_v6 }
   0xf   :  { %2971 = vmatprep.mubr.msk.f32.mxu0 %vm58_vm0, %v64_v7 }
  0x12   :  { %2972 = vmatmul.mubr.msk.f32.gmra.mrb[4].mxu0 %vm58_vm0, %v65_v8 }
  0x13   :  { %2974 = vmatprep.mubr.msk.f32.mxu0 %vm58_vm0, %v66_v12 }
  0x14   :  { %21 = vsyncpa [#allocation4], 0  ;;  %v68_v16 = vld [vmem:[%s4086_s27 + $0x40] sm:$0xff]  ;;  %3020 = vmatmul.mubr.msk.f32.gmra.mrb[2].mxu1 %vm58_vm0, %v97_v13  ;;  %v99_v17 = vld [vmem:[%s4086_s27 + $0x138] sm:$0xff]  ;;  %vm729_vm3 = vcmask 261120   ;;  %s3360_s21 = smov [#allocation3]  }
  0x15   :  { %3022 = vmatprep.mubr.msk.f32.mxu1 %vm58_vm0, %v98_v15  ;;  %v69_v18 = vld [vmem:[%s4086_s27 + $0x48] sm:$0xff]  ;;  %v100_v19 = vld [vmem:[%s4086_s27 + $0x140] sm:$0xff]  ;;  %v70_v20 = vld [vmem:[%s4086_s27 + $0x50] sm:$0xff] }
  0x16   :  { %2975 = vmatmul.mubr.msk.f32.gmra.mrb[6].mxu0 %vm58_vm0, %v67_v14  ;;  %v101_v21 = vld [vmem:[%s4086_s27 + $0x148] sm:$0xff]  ;;  %v71_v22 = vld [vmem:[%s4086_s27 + $0x58] sm:$0xff]  ;;  %v102_v23 = vld [vmem:[%s4086_s27 + $0x150] sm:$0xff] }
  0x17   :  { %2977 = vmatprep.mubr.msk.f32.mxu0 %vm58_vm0, %v68_v16  ;;  %v72_v24 = vld [vmem:[%s4086_s27 + $0x60] sm:$0xff]  ;;  %v103_v25 = vld [vmem:[%s4086_s27 + $0x158] sm:$0xff]  ;;  %v73_v26 = vld [vmem:[%s4086_s27 + $0x68] sm:$0xff] }
  0x18   :  { %3023 = vmatmul.mubr.msk.f32.gmra.mrb[4].mxu1 %vm58_vm0, %v99_v17  ;;  %v104_v27 = vld [vmem:[%s4086_s27 + $0x160] sm:$0xff]  ;;  %v74_v28 = vld [vmem:[%s4086_s27 + $0x70] sm:$0xff]  ;;  %v105_v29 = vld [vmem:[%s4086_s27 + $0x168] sm:$0xff] }
  0x19   :  { %3025 = vmatprep.mubr.msk.f32.mxu1 %vm58_vm0, %v100_v19  ;;  %v75_v30 = vld [vmem:[%s4086_s27 + $0x78] sm:$0xff]  ;;  %v106_v31 = vld [vmem:[%s4086_s27 + $0x170] sm:$0xff]  ;;  %v76_v32 = vld [vmem:[%s4086_s27 + $0x80] sm:$0xff] }
  0x1a   :  { %2978 = vmatmul.mubr.msk.f32.gmra.mrb[8].mxu0 %vm58_vm0, %v69_v18  ;;  %v107_v33 = vld [vmem:[%s4086_s27 + $0x178] sm:$0xff]  ;;  %v77_v34 = vld [vmem:[%s4086_s27 + $0x88] sm:$0xff]  ;;  %v78_v35 = vld [vmem:[%s4086_s27 + $0x90] sm:$0xff] }
  0x1b   :  { %2980 = vmatprep.mubr.msk.f32.mxu0 %vm58_vm0, %v70_v20  ;;  %v79_v36 = vld [vmem:[%s4086_s27 + $0x98] sm:$0xff]  ;;  %v80_v37 = vld [vmem:[%s4086_s27 + $0xa0] sm:$0xff]  ;;  %v81_v38 = vld [vmem:[%s4086_s27 + $0xa8] sm:$0xff] }
  0x1c   :  { %3026 = vmatmul.mubr.msk.f32.gmra.mrb[6].mxu1 %vm58_vm0, %v101_v21  ;;  %v82_v39 = vld [vmem:[%s4086_s27 + $0xb0] sm:$0xff]  ;;  %v83_v40 = vld [vmem:[%s4086_s27 + $0xb8] sm:$0xff]  ;;  %v84_v41 = vld [vmem:[%s4086_s27 + $0xc0] sm:$0xff] }
  0x1d   :  { %3028 = vmatprep.mubr.msk.f32.mxu1 %vm58_vm0, %v102_v23  ;;  %v85_v42 = vld [vmem:[%s4086_s27 + $0xc8] sm:$0xff]  ;;  %v86_v43 = vld [vmem:[%s4086_s27 + $0xd0] sm:$0xff]  ;;  %v87_v44 = vld [vmem:[%s4086_s27 + $0xd8] sm:$0xff] }
  0x1e   :  { %2981 = vmatmul.mubr.msk.f32.gmra.mrb[10].mxu0 %vm58_vm0, %v71_v22  ;;  %v88_v45 = vld [vmem:[%s4086_s27 + $0xe0] sm:$0xff]  ;;  %v89_v46 = vld [vmem:[%s4086_s27 + $0xe8] sm:$0xff]  ;;  %v90_v47 = vld [vmem:[%s4086_s27 + $0xf0] sm:$0xff] }
  0x1f   :  { %2983 = vmatprep.mubr.msk.f32.mxu0 %vm58_vm0, %v72_v24  ;;  %v91_v48 = vld [vmem:[%s4086_s27 + $0xf8] sm:$0xff]  ;;  %v92_v49 = vld [vmem:[%s4086_s27 + $0x100] sm:$0xff]  ;;  %v93_v50 = vld [vmem:[%s4086_s27 + $0x108] sm:$0xff] }
  0x20   :  { %3029 = vmatmul.mubr.msk.f32.gmra.mrb[8].mxu1 %vm58_vm0, %v103_v25  ;;  %v113_v51 = vld [vmem:[%s4071_s4] sm:$0xff]  ;;  %v114_v52 = vld [vmem:[%s4071_s4 + $0x8] sm:$0xff]  ;;  %v115_v54 = vld [vmem:[%s4071_s4 + $0x10] sm:$0xff] }
  0x21   :  { %3031 = vmatprep.mubr.msk.f32.mxu1 %vm58_vm0, %v104_v27  ;;  %v3250_v53 = vpack.c.bf16 %v114_v52, %v113_v51  ;;  %v116_v55 = vld [vmem:[%s4071_s4 + $0x18] sm:$0xff]  ;;  %v3659_v57 = vld [vmem:[%s4070_s3] ss:$0 sm:$0xff] }
  0x22   :  { %2984 = vmatmul.mubr.msk.f32.gmra.mrb[12].mxu0 %vm58_vm0, %v73_v26  ;;  %v3254_v56 = vpack.c.bf16 %v116_v55, %v115_v54 }
  0x23   :  { %2986 = vmatprep.mubr.msk.f32.mxu0 %vm58_vm0, %v74_v28  ;;  %3251 = vmatprep.subr.bf16.mxu1 %v3250_v53 }
  0x24   :  { %3032 = vmatmul.mubr.msk.f32.gmra.mrb[10].mxu1 %vm58_vm0, %v105_v29 }
  0x25   :  { %3034 = vmatprep.mubr.msk.f32.mxu1 %vm58_vm0, %v106_v31  ;;  %3253 = vmatpush3.bf16.msra.mxu1 %v3250_v53 }
  0x26   :  { %2987 = vmatmul.mubr.msk.f32.gmra.mrb[14].mxu0 %vm58_vm0, %v75_v30  ;;  %3255 = vmatprep.subr.bf16.mxu1 %v3254_v56 }
  0x27   :  { %2989 = vmatprep.mubr.msk.f32.mxu0 %vm58_vm0, %v76_v32 }
  0x28   :  { %3035 = vmatmul.mubr.msk.f32.gmra.mrb[12].mxu1 %vm58_vm0, %v107_v33 }
  0x29   :  { %3257 = vmatpush3.bf16.msra.mxu1 %v3254_v56 }
  0x2a   :  { %2990 = vmatmul.mubr.msk.f32.gmra.mrb[16].mxu0 %vm58_vm0, %v77_v34 }
  0x2b   :  { %2992 = vmatprep.mubr.msk.f32.mxu0 %vm58_vm0, %v78_v35 }
  0x2e   :  { %2993 = vmatmul.mubr.msk.f32.gmra.mrb[18].mxu0 %vm58_vm0, %v79_v36 }
  0x2f   :  { %2995 = vmatprep.mubr.msk.f32.mxu0 %vm58_vm0, %v80_v37 }
  0x32   :  { %2996 = vmatmul.mubr.msk.f32.gmra.mrb[20].mxu0 %vm58_vm0, %v81_v38 }
  0x33   :  { %2998 = vmatprep.mubr.msk.f32.mxu0 %vm58_vm0, %v82_v39 }
  0x36   :  { %2999 = vmatmul.mubr.msk.f32.gmra.mrb[22].mxu0 %vm58_vm0, %v83_v40 }
  0x37   :  { %3001 = vmatprep.mubr.msk.f32.mxu0 %vm58_vm0, %v84_v41 }
  0x3a   :  { %3002 = vmatmul.mubr.msk.f32.gmra.mrb[24].mxu0 %vm58_vm0, %v85_v42 }
  0x3b   :  { %3004 = vmatprep.mubr.msk.f32.mxu0 %vm58_vm0, %v86_v43 }
  0x3e   :  { %3005 = vmatmul.mubr.msk.f32.gmra.mrb[26].mxu0 %vm58_vm0, %v87_v44 }
  0x3f   :  { %3007 = vmatprep.mubr.msk.f32.mxu0 %vm58_vm0, %v88_v45 }
  0x42   :  { %3008 = vmatmul.mubr.msk.f32.gmra.mrb[28].mxu0 %vm58_vm0, %v89_v46 }
  0x43   :  { %3010 = vmatprep.mubr.msk.f32.mxu0 %vm58_vm0, %v90_v47 }
  0x46   :  { %3011 = vmatmul.mubr.msk.f32.gmra.mrb[30].mxu0 %vm58_vm0, %v91_v48 }
  0x47   :  { %3013 = vmatprep.mubr.msk.f32.mxu0 %vm58_vm0, %v92_v49 }
  0x4a   :  { %3014 = vmatmul.mubr.msk.f32.gmra.mrb[32].mxu0 %vm58_vm0, %v93_v50 }
  0xdd   :  { %v2967_v58 = vpop.f32.mrb[0].mxu0 }
  0xde   :  { %v346_v59 = vadd.f32 %v2967_v58, %v3659_v57  ;;  %v340_v60 = vpop.f32.mrb[1].mxu0 }
  0xdf   :  { %v341_v61 = vadd.f32 %v3659_v57, %v340_v60  ;;  %v3666_v7 = vpop.f32.mrb[0].mxu1 }
  0xe0   :  { %v628_v62 = vmul.f32 0.2, %v346_v59  ;;  %vm580_vm1 = vcmp.ge.f32.partialorder %v346_v59, 0.0  ;;  %v3669_v10 = vpop.f32.mrb[1].mxu1 }
  0xe1   :  { %vm579_vm2 = vcmp.ge.f32.partialorder %v341_v61, 0.0  ;;  %v627_v63 = vmul.f32 0.2, %v341_v61  ;;  %v2970_v0 = vpop.f32.mrb[2].mxu0 }
  0xe2   :  { %v356_v1 = vadd.f32 %v2970_v0, %v3659_v57  ;;  %v350_v2 = vpop.f32.mrb[3].mxu0  ;;  %v676_v5 = vsel %vm580_vm1, %v346_v59, %v628_v62 }
  0xe3   :  { %v351_v3 = vadd.f32 %v3659_v57, %v350_v2  ;;  %v675_v4 = vsel %vm579_vm2, %v341_v61, %v627_v63 }
  0xe4   :  { %v630_v6 = vmul.f32 0.2, %v356_v1  ;;  %3045 = vmatprep.mubr.msk.f32.mxu1 %vm729_vm3, %v675_v4  ;;  %vm582_vm4 = vcmp.ge.f32.partialorder %v356_v1, 0.0 }
  0xe5   :  { %vm581_vm5 = vcmp.ge.f32.partialorder %v351_v3, 0.0  ;;  %v629_v8 = vmul.f32 0.2, %v351_v3  ;;  %v2973_v9 = vpop.f32.mrb[4].mxu0  ;;  %3046 = vmatmul.mubr.msk.f32.vlgmr.msra.gmra.mrb[14].mxu1 %vm729_vm3, %v676_v5 }
  0xe6   :  { %v366_v11 = vadd.f32 %v2973_v9, %v3659_v57  ;;  %v360_v12 = vpop.f32.mrb[5].mxu0  ;;  %v678_v16 = vsel %vm582_vm4, %v356_v1, %v630_v6 }
  0xe7   :  { %v361_v13 = vadd.f32 %v3659_v57, %v360_v12  ;;  %v677_v14 = vsel %vm581_vm5, %v351_v3, %v629_v8  ;;  %v3675_v19 = vpop.f32.mrb[2].mxu1 }
  0xe8   :  { %v632_v15 = vmul.f32 0.2, %v366_v11  ;;  %3048 = vmatprep.mubr.msk.f32.mxu1 %vm729_vm3, %v677_v14  ;;  %vm584_vm6 = vcmp.ge.f32.partialorder %v366_v11, 0.0  ;;  %v3678_v22 = vpop.f32.mrb[3].mxu1 }
  0xe9   :  { %vm583_vm7 = vcmp.ge.f32.partialorder %v361_v13, 0.0  ;;  %v631_v17 = vmul.f32 0.2, %v361_v13  ;;  %v2976_v18 = vpop.f32.mrb[6].mxu0  ;;  %3049 = vmatmul.mubr.msk.f32.gmra.mrb[16].mxu1 %vm729_vm3, %v678_v16 }
  0xea   :  { %v376_v20 = vadd.f32 %v2976_v18, %v3659_v57  ;;  %v370_v21 = vpop.f32.mrb[7].mxu0  ;;  %v680_v26 = vsel %vm584_vm6, %v366_v11, %v632_v15 }
  0xeb   :  { %v371_v23 = vadd.f32 %v3659_v57, %v370_v21  ;;  %v679_v24 = vsel %vm583_vm7, %v361_v13, %v631_v17  ;;  %v3683_v29 = vpop.f32.mrb[4].mxu1 }
  0xec   :  { %v634_v25 = vmul.f32 0.2, %v376_v20  ;;  %3051 = vmatprep.mubr.msk.f32.mxu1 %vm729_vm3, %v679_v24  ;;  %vm586_vm8 = vcmp.ge.f32.partialorder %v376_v20, 0.0  ;;  %v3686_v32 = vpop.f32.mrb[5].mxu1 }
  0xed   :  { %vm585_vm9 = vcmp.ge.f32.partialorder %v371_v23, 0.0  ;;  %v633_v27 = vmul.f32 0.2, %v371_v23  ;;  %v2979_v28 = vpop.f32.mrb[8].mxu0  ;;  %3052 = vmatmul.mubr.msk.f32.gmra.mrb[18].mxu1 %vm729_vm3, %v680_v26 }
  0xee   :  { %v386_v30 = vadd.f32 %v2979_v28, %v3659_v57  ;;  %v380_v31 = vpop.f32.mrb[9].mxu0  ;;  %v682_v36 = vsel %vm586_vm8, %v376_v20, %v634_v25 }
  0xef   :  { %v381_v33 = vadd.f32 %v3659_v57, %v380_v31  ;;  %v681_v34 = vsel %vm585_vm9, %v371_v23, %v633_v27  ;;  %v3690_v37 = vpop.f32.mrb[6].mxu1 }
  0xf0   :  { %v636_v35 = vmul.f32 0.2, %v386_v30  ;;  %3054 = vmatprep.mubr.msk.f32.mxu1 %vm729_vm3, %v681_v34  ;;  %vm588_vm10 = vcmp.ge.f32.partialorder %v386_v30, 0.0  ;;  %v3694_v42 = vpop.f32.mrb[7].mxu1 }
  0xf1   :  { %vm587_vm11 = vcmp.ge.f32.partialorder %v381_v33, 0.0  ;;  %v635_v38 = vmul.f32 0.2, %v381_v33  ;;  %v2982_v39 = vpop.f32.mrb[10].mxu0  ;;  %3055 = vmatmul.mubr.msk.f32.gmra.mrb[20].mxu1 %vm729_vm3, %v682_v36 }
  0xf2   :  { %v396_v40 = vadd.f32 %v2982_v39, %v3659_v57  ;;  %v390_v41 = vpop.f32.mrb[11].mxu0  ;;  %v684_v46 = vsel %vm588_vm10, %v386_v30, %v636_v35 }
  0xf3   :  { %v391_v43 = vadd.f32 %v3659_v57, %v390_v41  ;;  %v683_v44 = vsel %vm587_vm11, %v381_v33, %v635_v38  ;;  %v3698_v47 = vpop.f32.mrb[8].mxu1 }
  0xf4   :  { %v638_v45 = vmul.f32 0.2, %v396_v40  ;;  %3057 = vmatprep.mubr.msk.f32.mxu1 %vm729_vm3, %v683_v44  ;;  %vm590_vm12 = vcmp.ge.f32.partialorder %v396_v40, 0.0  ;;  %v3702_v52 = vpop.f32.mrb[9].mxu1 }
  0xf5   :  { %vm589_vm13 = vcmp.ge.f32.partialorder %v391_v43, 0.0  ;;  %v637_v48 = vmul.f32 0.2, %v391_v43  ;;  %v2985_v49 = vpop.f32.mrb[12].mxu0  ;;  %3058 = vmatmul.mubr.msk.f32.gmra.mrb[22].mxu1 %vm729_vm3, %v684_v46 }
  0xf6   :  { %v406_v50 = vadd.f32 %v2985_v49, %v3659_v57  ;;  %v400_v51 = vpop.f32.mrb[13].mxu0  ;;  %v686_v56 = vsel %vm590_vm12, %v396_v40, %v638_v45 }
  0xf7   :  { %v401_v53 = vadd.f32 %v3659_v57, %v400_v51  ;;  %v685_v54 = vsel %vm589_vm13, %v391_v43, %v637_v48  ;;  %v3706_v58 = vpop.f32.mrb[10].mxu1 }
  0xf8   :  { %v640_v55 = vmul.f32 0.2, %v406_v50  ;;  %3060 = vmatprep.mubr.msk.f32.mxu1 %vm729_vm3, %v685_v54  ;;  %vm592_vm14 = vcmp.ge.f32.partialorder %v406_v50, 0.0  ;;  %v3710_v63 = vpop.f32.mrb[11].mxu1 }
  0xf9   :  { %vm591_vm15 = vcmp.ge.f32.partialorder %v401_v53, 0.0  ;;  %v639_v59 = vmul.f32 0.2, %v401_v53  ;;  %v2988_v60 = vpop.f32.mrb[14].mxu0  ;;  %3061 = vmatmul.mubr.msk.f32.gmra.mrb[24].mxu1 %vm729_vm3, %v686_v56 }
  0xfa   :  { %v416_v61 = vadd.f32 %v2988_v60, %v3659_v57  ;;  %v410_v62 = vpop.f32.mrb[15].mxu0  ;;  %v688_v3 = vsel %vm592_vm14, %v406_v50, %v640_v55 }
  0xfb   :  { %v411_v0 = vadd.f32 %v3659_v57, %v410_v62  ;;  %v687_v1 = vsel %vm591_vm15, %v401_v53, %v639_v59  ;;  %v3714_v4 = vpop.f32.mrb[12].mxu1 }
  0xfc   :  { %v642_v2 = vmul.f32 0.2, %v416_v61  ;;  %3063 = vmatprep.mubr.msk.f32.mxu1 %vm729_vm3, %v687_v1  ;;  %vm594_vm1 = vcmp.ge.f32.partialorder %v416_v61, 0.0  ;;  %v3718_v11 = vpop.f32.mrb[13].mxu1 }
  0xfd   :  { %vm593_vm2 = vcmp.ge.f32.partialorder %v411_v0, 0.0  ;;  %v641_v5 = vmul.f32 0.2, %v411_v0  ;;  %v2991_v6 = vpop.f32.mrb[16].mxu0  ;;  %3064 = vmatmul.mubr.msk.f32.gmra.mrb[26].mxu1 %vm729_vm3, %v688_v3 }
  0xfe   :  { %v426_v8 = vadd.f32 %v2991_v6, %v3659_v57  ;;  %v420_v9 = vpop.f32.mrb[17].mxu0  ;;  %v690_v15 = vsel %vm594_vm1, %v416_v61, %v642_v2 }
  0xff   :  { %v421_v12 = vadd.f32 %v3659_v57, %v420_v9  ;;  %v689_v13 = vsel %vm593_vm2, %v411_v0, %v641_v5 }
 0x100   :  { %v644_v14 = vmul.f32 0.2, %v426_v8  ;;  %3066 = vmatprep.mubr.msk.f32.mxu1 %vm729_vm3, %v689_v13  ;;  %vm596_vm4 = vcmp.ge.f32.partialorder %v426_v8, 0.0 }
 0x101   :  { %vm595_vm5 = vcmp.ge.f32.partialorder %v421_v12, 0.0  ;;  %v643_v16 = vmul.f32 0.2, %v421_v12  ;;  %v2994_v17 = vpop.f32.mrb[18].mxu0  ;;  %3067 = vmatmul.mubr.msk.f32.gmra.mrb[28].mxu1 %vm729_vm3, %v690_v15 }
 0x102   :  { %v436_v18 = vadd.f32 %v2994_v17, %v3659_v57  ;;  %v430_v20 = vpop.f32.mrb[19].mxu0  ;;  %v692_v25 = vsel %vm596_vm4, %v426_v8, %v644_v14 }
 0x103   :  { %v431_v21 = vadd.f32 %v3659_v57, %v430_v20  ;;  %v691_v23 = vsel %vm595_vm5, %v421_v12, %v643_v16 }
 0x104   :  { %v646_v24 = vmul.f32 0.2, %v436_v18  ;;  %3069 = vmatprep.mubr.msk.f32.mxu1 %vm729_vm3, %v691_v23  ;;  %vm598_vm6 = vcmp.ge.f32.partialorder %v436_v18, 0.0  ;;  %v511_v23 = vadd.f32 %v3659_v57, %v3669_v10  ;;  %v521_v10 = vadd.f32 %v3659_v57, %v3678_v22 }
 0x105   :  { %vm597_vm7 = vcmp.ge.f32.partialorder %v431_v21, 0.0  ;;  %v645_v26 = vmul.f32 0.2, %v431_v21  ;;  %v2997_v27 = vpop.f32.mrb[20].mxu0  ;;  %3070 = vmatmul.mubr.msk.f32.gmra.mrb[30].mxu1 %vm729_vm3, %v692_v25 }
 0x106   :  { %v446_v28 = vadd.f32 %v2997_v27, %v3659_v57  ;;  %v440_v30 = vpop.f32.mrb[21].mxu0  ;;  %v694_v35 = vsel %vm598_vm6, %v436_v18, %v646_v24  ;;  %vm613_vm6 = vcmp.ge.f32.partialorder %v511_v23, 0.0 }
 0x107   :  { %v441_v31 = vadd.f32 %v3659_v57, %v440_v30  ;;  %v693_v33 = vsel %vm597_vm7, %v431_v21, %v645_v26 }
 0x108   :  { %v648_v34 = vmul.f32 0.2, %v446_v28  ;;  %3072 = vmatprep.mubr.msk.f32.mxu1 %vm729_vm3, %v693_v33  ;;  %vm600_vm8 = vcmp.ge.f32.partialorder %v446_v28, 0.0 }
 0x109   :  { %vm599_vm9 = vcmp.ge.f32.partialorder %v441_v31, 0.0  ;;  %v647_v36 = vmul.f32 0.2, %v441_v31  ;;  %v3000_v38 = vpop.f32.mrb[22].mxu0  ;;  %3073 = vmatmul.mubr.msk.f32.gmra.mrb[32].mxu1 %vm729_vm3, %v694_v35 }
 0x10a   :  { %v456_v39 = vadd.f32 %v3000_v38, %v3659_v57  ;;  %v450_v40 = vpop.f32.mrb[23].mxu0  ;;  %v696_v45 = vsel %vm600_vm8, %v446_v28, %v648_v34  ;;  %v661_v34 = vmul.f32 0.2, %v511_v23  ;;  %v516_v38 = vadd.f32 %v3666_v7, %v3659_v57 }
 0x10b   :  { %v451_v41 = vadd.f32 %v3659_v57, %v450_v40  ;;  %v695_v43 = vsel %vm599_vm9, %v441_v31, %v647_v36  ;;  %vm615_vm9 = vcmp.ge.f32.partialorder %v521_v10, 0.0  ;;  %v536_v7 = vadd.f32 %v3683_v29, %v3659_v57 }
 0x10c   :  { %v650_v44 = vmul.f32 0.2, %v456_v39  ;;  %3075 = vmatprep.mubr.msk.f32.mxu1 %vm729_vm3, %v695_v43  ;;  %vm602_vm10 = vcmp.ge.f32.partialorder %v456_v39, 0.0  ;;  %v709_v43 = vsel %vm613_vm6, %v511_v23, %v661_v34  ;;  %v662_v22 = vmul.f32 0.2, %v516_v38 }
 0x10d   :  { %vm601_vm11 = vcmp.ge.f32.partialorder %v451_v41, 0.0  ;;  %v649_v46 = vmul.f32 0.2, %v451_v41  ;;  %v3003_v48 = vpop.f32.mrb[24].mxu0  ;;  %3076 = vmatmul.mubr.msk.f32.gmra.mrb[34].mxu1 %vm729_vm3, %v696_v45  ;;  %v526_v45 = vadd.f32 %v3675_v19, %v3659_v57  ;;  %v666_v19 = vmul.f32 0.2, %v536_v7 }
 0x10e   :  { %v466_v49 = vadd.f32 %v3003_v48, %v3659_v57  ;;  %v460_v50 = vpop.f32.mrb[25].mxu0  ;;  %v698_v55 = vsel %vm602_vm10, %v456_v39, %v650_v44  ;;  %v531_v44 = vadd.f32 %v3659_v57, %v3686_v32  ;;  %vm614_vm10 = vcmp.ge.f32.partialorder %v516_v38, 0.0 }
 0x10f   :  { %v461_v51 = vadd.f32 %v3659_v57, %v460_v50  ;;  %v697_v53 = vsel %vm601_vm11, %v451_v41, %v649_v46  ;;  %v663_v41 = vmul.f32 0.2, %v521_v10  ;;  %v541_v32 = vadd.f32 %v3659_v57, %v3694_v42 }
 0x110   :  { %v652_v54 = vmul.f32 0.2, %v466_v49  ;;  %3078 = vmatprep.mubr.msk.f32.mxu1 %vm729_vm3, %v697_v53  ;;  %vm604_vm12 = vcmp.ge.f32.partialorder %v466_v49, 0.0  ;;  %v664_v50 = vmul.f32 0.2, %v526_v45  ;;  %vm617_vm11 = vcmp.ge.f32.partialorder %v531_v44, 0.0 }
 0x111   :  { %vm603_vm13 = vcmp.ge.f32.partialorder %v461_v51, 0.0  ;;  %v651_v56 = vmul.f32 0.2, %v461_v51  ;;  %v3006_v59 = vpop.f32.mrb[26].mxu0  ;;  %3079 = vmatmul.mubr.msk.f32.gmra.mrb[36].mxu1 %vm729_vm3, %v698_v55  ;;  %v711_v48 = vsel %vm615_vm9, %v521_v10, %v663_v41  ;;  %v546_v53 = vadd.f32 %v3690_v37, %v3659_v57 }
 0x112   :  { %v476_v60 = vadd.f32 %v3006_v59, %v3659_v57  ;;  %v470_v61 = vpop.f32.mrb[27].mxu0  ;;  %v700_v2 = vsel %vm604_vm12, %v466_v49, %v652_v54  ;;  %v665_v49 = vmul.f32 0.2, %v531_v44  ;;  %vm616_vm12 = vcmp.ge.f32.partialorder %v526_v45, 0.0 }
 0x113   :  { %v471_v62 = vadd.f32 %v3659_v57, %v470_v61  ;;  %v699_v0 = vsel %vm603_vm13, %v461_v51, %v651_v56  ;;  %v710_v51 = vsel %vm614_vm10, %v516_v38, %v662_v22  ;;  %vm618_vm13 = vcmp.ge.f32.partialorder %v536_v7, 0.0 }
 0x114   :  { %v654_v1 = vmul.f32 0.2, %v476_v60  ;;  %3081 = vmatprep.mubr.msk.f32.mxu1 %vm729_vm3, %v699_v0  ;;  %vm606_vm14 = vcmp.ge.f32.partialorder %v476_v60, 0.0  ;;  %v667_v54 = vmul.f32 0.2, %v541_v32  ;;  %v713_v29 = vsel %vm617_vm11, %v531_v44, %v665_v49 }
 0x115   :  { %vm605_vm15 = vcmp.ge.f32.partialorder %v471_v62, 0.0  ;;  %v653_v3 = vmul.f32 0.2, %v471_v62  ;;  %v3009_v5 = vpop.f32.mrb[28].mxu0  ;;  %3082 = vmatmul.mubr.msk.f32.gmra.mrb[38].mxu1 %vm729_vm3, %v700_v2  ;;  %v551_v55 = vadd.f32 %v3659_v57, %v3702_v52  ;;  %v712_v56 = vsel %vm616_vm12, %v526_v45, %v664_v50 }
 0x116   :  { %v486_v6 = vadd.f32 %v3009_v5, %v3659_v57  ;;  %v480_v8 = vpop.f32.mrb[29].mxu0  ;;  %v702_v14 = vsel %vm606_vm14, %v476_v60, %v654_v1  ;;  %vm619_vm14 = vcmp.ge.f32.partialorder %v541_v32, 0.0  ;;  %v668_v42 = vmul.f32 0.2, %v546_v53  ;;  %v119_v5 = vld [vmem:[%s4073_s6 + $0x8] sm:$0xff] }
 0x117   :  { %v481_v9 = vadd.f32 %v3659_v57, %v480_v8  ;;  %v701_v12 = vsel %vm605_vm15, %v471_v62, %v653_v3  ;;  %v556_v59 = vadd.f32 %v3698_v47, %v3659_v57  ;;  %v714_v60 = vsel %vm618_vm13, %v536_v7, %v666_v19 }
 0x118   :  { %v656_v13 = vmul.f32 0.2, %v486_v6  ;;  %3084 = vmatprep.mubr.msk.f32.mxu1 %vm729_vm3, %v701_v12  ;;  %vm608_vm1 = vcmp.ge.f32.partialorder %v486_v6, 0.0  ;;  %vm620_vm15 = vcmp.ge.f32.partialorder %v546_v53, 0.0  ;;  %v669_v61 = vmul.f32 0.2, %v551_v55 }
 0x119   :  { %vm607_vm2 = vcmp.ge.f32.partialorder %v481_v9, 0.0  ;;  %v655_v15 = vmul.f32 0.2, %v481_v9  ;;  %v3012_v16 = vpop.f32.mrb[30].mxu0  ;;  %3085 = vmatmul.mubr.msk.f32.gmra.mrb[40].mxu1 %vm729_vm3, %v702_v14  ;;  %v715_v37 = vsel %vm619_vm14, %v541_v32, %v667_v54  ;;  %v561_v62 = vadd.f32 %v3659_v57, %v3710_v63  ;;  %v118_v63 = vld [vmem:[%s4073_s6] sm:$0xff]  ;;  %v121_v14 = vld [vmem:[%s4073_s6 + $0x18] sm:$0xff] }
 0x11a   :  { %v496_v17 = vadd.f32 %v3012_v16, %v3659_v57  ;;  %v490_v18 = vpop.f32.mrb[31].mxu0  ;;  %v704_v25 = vsel %vm608_vm1, %v486_v6, %v656_v13  ;;  %vm621_vm1 = vcmp.ge.f32.partialorder %v551_v55, 0.0  ;;  %v670_v52 = vmul.f32 0.2, %v556_v59  ;;  %v120_v13 = vld [vmem:[%s4073_s6 + $0x10] sm:$0xff] }
 0x11b   :  { %v491_v20 = vadd.f32 %v3659_v57, %v490_v18  ;;  %v703_v21 = vsel %vm607_vm2, %v481_v9, %v655_v15  ;;  %v566_v0 = vadd.f32 %v3706_v58, %v3659_v57  ;;  %v716_v1 = vsel %vm620_vm15, %v546_v53, %v668_v42  ;;  %v3814_v18 = vld [vmem:[%s4072_s5] ss:$0 sm:$0xff] }
 0x11c   :  { %v658_v24 = vmul.f32 0.2, %v496_v17  ;;  %3087 = vmatprep.mubr.msk.f32.mxu1 %vm729_vm3, %v703_v21  ;;  %vm610_vm4 = vcmp.ge.f32.partialorder %v496_v17, 0.0  ;;  %vm622_vm2 = vcmp.ge.f32.partialorder %v556_v59, 0.0  ;;  %v671_v2 = vmul.f32 0.2, %v561_v62 }
 0x11d   :  { %vm609_vm5 = vcmp.ge.f32.partialorder %v491_v20, 0.0  ;;  %v657_v26 = vmul.f32 0.2, %v491_v20  ;;  %3088 = vmatmul.mubr.msk.f32.gmra.mrb[42].mxu1 %vm729_vm3, %v704_v25  ;;  %v3015_v27 = vpop.f32.mrb[32].mxu0  ;;  %v717_v47 = vsel %vm621_vm1, %v551_v55, %v669_v61  ;;  %v571_v3 = vadd.f32 %v3659_v57, %v3718_v11 }
 0x11e   :  { %v506_v28 = vadd.f32 %v3015_v27, %v3659_v57  ;;  %v500_v30 = vpop.f32.mrb[33].mxu0  ;;  %v706_v35 = vsel %vm610_vm4, %v496_v17, %v658_v24  ;;  %vm623_vm4 = vcmp.ge.f32.partialorder %v561_v62, 0.0  ;;  %v672_v6 = vmul.f32 0.2, %v566_v0 }
 0x11f   :  { %v705_v31 = vsel %vm609_vm5, %v491_v20, %v657_v26  ;;  %v501_v33 = vadd.f32 %v3659_v57, %v500_v30  ;;  %v576_v58 = vadd.f32 %v3714_v4, %v3659_v57  ;;  %v718_v8 = vsel %vm622_vm2, %v556_v59, %v670_v52 }
 0x120   :  { %3090 = vmatprep.mubr.msk.f32.mxu1 %vm729_vm3, %v705_v31  ;;  %v660_v36 = vmul.f32 0.2, %v506_v28  ;;  %vm612_vm7 = vcmp.ge.f32.partialorder %v506_v28, 0.0  ;;  %v3258_v9 = vpack.c.bf16 %v119_v5, %v118_v63  ;;  %vm624_vm5 = vcmp.ge.f32.partialorder %v566_v0, 0.0 }
 0x121   :  { %3091 = vmatmul.mubr.msk.f32.gmra.mrb[44].mxu1 %vm729_vm3, %v706_v35  ;;  %vm611_vm8 = vcmp.ge.f32.partialorder %v501_v33, 0.0  ;;  %v659_v39 = vmul.f32 0.2, %v501_v33  ;;  %v673_v11 = vmul.f32 0.2, %v571_v3  ;;  %v719_v12 = vsel %vm623_vm4, %v561_v62, %v671_v2 }
 0x122   :  { %v708_v46 = vsel %vm612_vm7, %v506_v28, %v660_v36  ;;  %vm625_vm6 = vcmp.ge.f32.partialorder %v571_v3, 0.0  ;;  %3259 = vmatprep.subr.bf16.mxu0 %v3258_v9  ;;  %v674_v15 = vmul.f32 0.2, %v576_v58  ;;  %v720_v57 = vsel %vm624_vm5, %v566_v0, %v672_v6 }
 0x123   :  { %v707_v40 = vsel %vm611_vm8, %v501_v33, %v659_v39  ;;  %3261 = vmatpush3.bf16.msra.mxu0 %v3258_v9  ;;  %v3262_v4 = vpack.c.bf16 %v121_v14, %v120_v13  ;;  %vm626_vm7 = vcmp.ge.f32.partialorder %v576_v58, 0.0  ;;  %v721_v16 = vsel %vm625_vm6, %v571_v3, %v673_v11 }
 0x124   :  { %3093 = vmatprep.mubr.msk.f32.mxu1 %vm729_vm3, %v707_v40  ;;  %v722_v17 = vsel %vm626_vm7, %v576_v58, %v674_v15 }
 0x125   :  { %3094 = vmatmul.mubr.msk.f32.gmra.mrb[46].mxu1 %vm729_vm3, %v708_v46  ;;  %3263 = vmatprep.subr.bf16.mxu0 %v3262_v4 }
 0x126   :  { %3096 = vmatprep.mubr.msk.f32.mxu1 %vm729_vm3, %v709_v43 }
 0x127   :  { %3265 = vmatpush3.bf16.msra.mxu0 %v3262_v4 }
 0x129   :  { %3097 = vmatmul.mubr.msk.f32.gmra.mrb[48].mxu1 %vm729_vm3, %v710_v51 }
 0x12a   :  { %3099 = vmatprep.mubr.msk.f32.mxu1 %vm729_vm3, %v711_v48 }
 0x12d   :  { %3100 = vmatmul.mubr.msk.f32.gmra.mrb[50].mxu1 %vm729_vm3, %v712_v56 }
 0x12e   :  { %3102 = vmatprep.mubr.msk.f32.mxu1 %vm729_vm3, %v713_v29 }
 0x131   :  { %3103 = vmatmul.mubr.msk.f32.gmra.mrb[52].mxu1 %vm729_vm3, %v714_v60 }
 0x132   :  { %3105 = vmatprep.mubr.msk.f32.mxu1 %vm729_vm3, %v715_v37 }
 0x135   :  { %3106 = vmatmul.mubr.msk.f32.gmra.mrb[54].mxu1 %vm729_vm3, %v716_v1 }
 0x136   :  { %3108 = vmatprep.mubr.msk.f32.mxu1 %vm729_vm3, %v717_v47 }
 0x139   :  { %3109 = vmatmul.mubr.msk.f32.gmra.mrb[56].mxu1 %vm729_vm3, %v718_v8 }
 0x13a   :  { %3111 = vmatprep.mubr.msk.f32.mxu1 %vm729_vm3, %v719_v12 }
 0x13d   :  { %3112 = vmatmul.mubr.msk.f32.gmra.mrb[58].mxu1 %vm729_vm3, %v720_v57 }
 0x13e   :  { %3114 = vmatprep.mubr.msk.f32.mxu1 %vm729_vm3, %v721_v16 }
 0x141   :  { %3115 = vmatmul.mubr.msk.f32.gmra.mrb[60].mxu1 %vm729_vm3, %v722_v17 }
 0x1b8   :  { %v3047_v20 = vpop.f32.mrb[14].mxu1 }
 0x1b9   :  { %v946_v21 = vadd.f32 %v3047_v20, %v3814_v18  ;;  %v940_v23 = vpop.f32.mrb[15].mxu1 }
 0x1ba   :  { %v941_v24 = vadd.f32 %v3814_v18, %v940_v23 }
 0x1bb   :  { %v1228_v25 = vmul.f32 0.2, %v946_v21  ;;  %vm1180_vm8 = vcmp.ge.f32.partialorder %v946_v21, 0.0 }
 0x1bc   :  { %vm1179_vm9 = vcmp.ge.f32.partialorder %v941_v24, 0.0  ;;  %v1227_v26 = vmul.f32 0.2, %v941_v24  ;;  %v3050_v27 = vpop.f32.mrb[16].mxu1 }
 0x1bd   :  { %v956_v28 = vadd.f32 %v3050_v27, %v3814_v18  ;;  %v950_v30 = vpop.f32.mrb[17].mxu1  ;;  %v1276_v34 = vsel %vm1180_vm8, %v946_v21, %v1228_v25 }
 0x1be   :  { %v951_v31 = vadd.f32 %v3814_v18, %v950_v30  ;;  %v1275_v33 = vsel %vm1179_vm9, %v941_v24, %v1227_v26 }
 0x1bf   :  { %v1230_v10 = vmul.f32 0.2, %v956_v28  ;;  %3125 = vmatprep.mubr.msk.f32.mxu0 %vm729_vm3, %v1275_v33  ;;  %vm1182_vm10 = vcmp.ge.f32.partialorder %v956_v28, 0.0 }
 0x1c0   :  { %vm1181_vm11 = vcmp.ge.f32.partialorder %v951_v31, 0.0  ;;  %v1229_v35 = vmul.f32 0.2, %v951_v31  ;;  %v3053_v36 = vpop.f32.mrb[18].mxu1  ;;  %3126 = vmatmul.mubr.msk.f32.vlgmr.msra.gmra.mrb[34].mxu0 %vm729_vm3, %v1276_v34 }
 0x1c1   :  { %v966_v38 = vadd.f32 %v3053_v36, %v3814_v18  ;;  %v960_v39 = vpop.f32.mrb[19].mxu1  ;;  %v1278_v44 = vsel %vm1182_vm10, %v956_v28, %v1230_v10 }
 0x1c2   :  { %v961_v40 = vadd.f32 %v3814_v18, %v960_v39  ;;  %v1277_v41 = vsel %vm1181_vm11, %v951_v31, %v1229_v35 }
 0x1c3   :  { %v1232_v43 = vmul.f32 0.2, %v966_v38  ;;  %3128 = vmatprep.mubr.msk.f32.mxu0 %vm729_vm3, %v1277_v41  ;;  %vm1184_vm12 = vcmp.ge.f32.partialorder %v966_v38, 0.0 }
 0x1c4   :  { %vm1183_vm13 = vcmp.ge.f32.partialorder %v961_v40, 0.0  ;;  %v1231_v22 = vmul.f32 0.2, %v961_v40  ;;  %v3056_v45 = vpop.f32.mrb[20].mxu1  ;;  %3129 = vmatmul.mubr.msk.f32.gmra.mrb[36].mxu0 %vm729_vm3, %v1278_v44 }
 0x1c5   :  { %v976_v46 = vadd.f32 %v3056_v45, %v3814_v18  ;;  %v970_v7 = vpop.f32.mrb[21].mxu1  ;;  %v1280_v50 = vsel %vm1184_vm12, %v966_v38, %v1232_v43 }
 0x1c6   :  { %v971_v48 = vadd.f32 %v3814_v18, %v970_v7  ;;  %v1279_v49 = vsel %vm1183_vm13, %v961_v40, %v1231_v22 }
 0x1c7   :  { %v1234_v32 = vmul.f32 0.2, %v976_v46  ;;  %3131 = vmatprep.mubr.msk.f32.mxu0 %vm729_vm3, %v1279_v49  ;;  %vm1186_vm14 = vcmp.ge.f32.partialorder %v976_v46, 0.0 }
 0x1c8   :  { %vm1185_vm15 = vcmp.ge.f32.partialorder %v971_v48, 0.0  ;;  %v1233_v51 = vmul.f32 0.2, %v971_v48  ;;  %v3059_v19 = vpop.f32.mrb[22].mxu1  ;;  %3132 = vmatmul.mubr.msk.f32.gmra.mrb[38].mxu0 %vm729_vm3, %v1280_v50 }
 0x1c9   :  { %v986_v53 = vadd.f32 %v3059_v19, %v3814_v18  ;;  %v980_v54 = vpop.f32.mrb[23].mxu1  ;;  %v1282_v42 = vsel %vm1186_vm14, %v976_v46, %v1234_v32 }
 0x1ca   :  { %v981_v29 = vadd.f32 %v3814_v18, %v980_v54  ;;  %v1281_v55 = vsel %vm1185_vm15, %v971_v48, %v1233_v51 }
 0x1cb   :  { %v1236_v56 = vmul.f32 0.2, %v986_v53  ;;  %3134 = vmatprep.mubr.msk.f32.mxu0 %vm729_vm3, %v1281_v55  ;;  %vm1188_vm1 = vcmp.ge.f32.partialorder %v986_v53, 0.0 }
 0x1cc   :  { %vm1187_vm2 = vcmp.ge.f32.partialorder %v981_v29, 0.0  ;;  %v1235_v59 = vmul.f32 0.2, %v981_v29  ;;  %v3062_v60 = vpop.f32.mrb[24].mxu1  ;;  %3135 = vmatmul.mubr.msk.f32.gmra.mrb[40].mxu0 %vm729_vm3, %v1282_v42 }
 0x1cd   :  { %v996_v61 = vadd.f32 %v3062_v60, %v3814_v18  ;;  %v990_v37 = vpop.f32.mrb[25].mxu1  ;;  %v1284_v1 = vsel %vm1188_vm1, %v986_v53, %v1236_v56 }
 0x1ce   :  { %v991_v62 = vadd.f32 %v3814_v18, %v990_v37  ;;  %v1283_v52 = vsel %vm1187_vm2, %v981_v29, %v1235_v59 }
 0x1cf   :  { %v1238_v0 = vmul.f32 0.2, %v996_v61  ;;  %3137 = vmatprep.mubr.msk.f32.mxu0 %vm729_vm3, %v1283_v52  ;;  %vm1190_vm4 = vcmp.ge.f32.partialorder %v996_v61, 0.0 }
 0x1d0   :  { %vm1189_vm5 = vcmp.ge.f32.partialorder %v991_v62, 0.0  ;;  %v1237_v2 = vmul.f32 0.2, %v991_v62  ;;  %v3065_v47 = vpop.f32.mrb[26].mxu1  ;;  %3138 = vmatmul.mubr.msk.f32.gmra.mrb[42].mxu0 %vm729_vm3, %v1284_v1 }
 0x1d1   :  { %v1006_v3 = vadd.f32 %v3065_v47, %v3814_v18  ;;  %v1000_v63 = vpop.f32.mrb[27].mxu1  ;;  %v1286_v8 = vsel %vm1190_vm4, %v996_v61, %v1238_v0 }
 0x1d2   :  { %v1001_v5 = vadd.f32 %v3814_v18, %v1000_v63  ;;  %v1285_v6 = vsel %vm1189_vm5, %v991_v62, %v1237_v2 }
 0x1d3   :  { %v1240_v58 = vmul.f32 0.2, %v1006_v3  ;;  %3140 = vmatprep.mubr.msk.f32.mxu0 %vm729_vm3, %v1285_v6  ;;  %vm1192_vm6 = vcmp.ge.f32.partialorder %v1006_v3, 0.0 }
 0x1d4   :  { %vm1191_vm7 = vcmp.ge.f32.partialorder %v1001_v5, 0.0  ;;  %v1239_v9 = vmul.f32 0.2, %v1001_v5  ;;  %v3068_v11 = vpop.f32.mrb[28].mxu1  ;;  %3141 = vmatmul.mubr.msk.f32.gmra.mrb[44].mxu0 %vm729_vm3, %v1286_v8 }
 0x1d5   :  { %v1016_v12 = vadd.f32 %v3068_v11, %v3814_v18  ;;  %v1010_v13 = vpop.f32.mrb[29].mxu1  ;;  %v1288_v4 = vsel %vm1192_vm6, %v1006_v3, %v1240_v58 }
 0x1d6   :  { %v1011_v14 = vadd.f32 %v3814_v18, %v1010_v13  ;;  %v1287_v15 = vsel %vm1191_vm7, %v1001_v5, %v1239_v9 }
 0x1d7   :  { %v1242_v57 = vmul.f32 0.2, %v1016_v12  ;;  %3143 = vmatprep.mubr.msk.f32.mxu0 %vm729_vm3, %v1287_v15  ;;  %vm1194_vm8 = vcmp.ge.f32.partialorder %v1016_v12, 0.0 }
 0x1d8   :  { %vm1193_vm9 = vcmp.ge.f32.partialorder %v1011_v14, 0.0  ;;  %v1241_v16 = vmul.f32 0.2, %v1011_v14  ;;  %v3071_v17 = vpop.f32.mrb[30].mxu1  ;;  %3144 = vmatmul.mubr.msk.f32.gmra.mrb[46].mxu0 %vm729_vm3, %v1288_v4 }
 0x1d9   :  { %v1026_v20 = vadd.f32 %v3071_v17, %v3814_v18  ;;  %v1020_v21 = vpop.f32.mrb[31].mxu1  ;;  %v1290_v26 = vsel %vm1194_vm8, %v1016_v12, %v1242_v57 }
 0x1da   :  { %v1021_v23 = vadd.f32 %v3814_v18, %v1020_v21  ;;  %v1289_v24 = vsel %vm1193_vm9, %v1011_v14, %v1241_v16 }
 0x1db   :  { %v1244_v25 = vmul.f32 0.2, %v1026_v20  ;;  %3146 = vmatprep.mubr.msk.f32.mxu0 %vm729_vm3, %v1289_v24  ;;  %vm1196_vm10 = vcmp.ge.f32.partialorder %v1026_v20, 0.0 }
 0x1dc   :  { %vm1195_vm11 = vcmp.ge.f32.partialorder %v1021_v23, 0.0  ;;  %v1243_v27 = vmul.f32 0.2, %v1021_v23  ;;  %v3074_v28 = vpop.f32.mrb[32].mxu1  ;;  %3147 = vmatmul.mubr.msk.f32.gmra.mrb[48].mxu0 %vm729_vm3, %v1290_v26 }
 0x1dd   :  { %v1036_v30 = vadd.f32 %v3074_v28, %v3814_v18  ;;  %v1030_v31 = vpop.f32.mrb[33].mxu1  ;;  %v1292_v35 = vsel %vm1196_vm10, %v1026_v20, %v1244_v25 }
 0x1de   :  { %v1031_v33 = vadd.f32 %v3814_v18, %v1030_v31  ;;  %v1291_v34 = vsel %vm1195_vm11, %v1021_v23, %v1243_v27 }
 0x1df   :  { %v1246_v10 = vmul.f32 0.2, %v1036_v30  ;;  %3149 = vmatprep.mubr.msk.f32.mxu0 %vm729_vm3, %v1291_v34  ;;  %vm1198_vm12 = vcmp.ge.f32.partialorder %v1036_v30, 0.0 }
 0x1e0   :  { %vm1197_vm13 = vcmp.ge.f32.partialorder %v1031_v33, 0.0  ;;  %v1245_v36 = vmul.f32 0.2, %v1031_v33  ;;  %v3077_v38 = vpop.f32.mrb[34].mxu1  ;;  %3150 = vmatmul.mubr.msk.f32.gmra.mrb[50].mxu0 %vm729_vm3, %v1292_v35 }
 0x1e1   :  { %v1046_v39 = vadd.f32 %v3077_v38, %v3814_v18  ;;  %v1040_v40 = vpop.f32.mrb[35].mxu1  ;;  %v1294_v22 = vsel %vm1198_vm12, %v1036_v30, %v1246_v10 }
 0x1e2   :  { %v1041_v41 = vadd.f32 %v3814_v18, %v1040_v40  ;;  %v1293_v43 = vsel %vm1197_vm13, %v1031_v33, %v1245_v36 }
 0x1e3   :  { %v1248_v44 = vmul.f32 0.2, %v1046_v39  ;;  %3152 = vmatprep.mubr.msk.f32.mxu0 %vm729_vm3, %v1293_v43  ;;  %vm1200_vm14 = vcmp.ge.f32.partialorder %v1046_v39, 0.0 }
 0x1e4   :  { %vm1199_vm15 = vcmp.ge.f32.partialorder %v1041_v41, 0.0  ;;  %v1247_v45 = vmul.f32 0.2, %v1041_v41  ;;  %v3080_v46 = vpop.f32.mrb[36].mxu1  ;;  %3153 = vmatmul.mubr.msk.f32.gmra.mrb[52].mxu0 %vm729_vm3, %v1294_v22 }
 0x1e5   :  { %v1056_v7 = vadd.f32 %v3080_v46, %v3814_v18  ;;  %v1050_v48 = vpop.f32.mrb[37].mxu1  ;;  %v1296_v51 = vsel %vm1200_vm14, %v1046_v39, %v1248_v44 }
 0x1e6   :  { %v1051_v49 = vadd.f32 %v3814_v18, %v1050_v48  ;;  %v1295_v32 = vsel %vm1199_vm15, %v1041_v41, %v1247_v45 }
 0x1e7   :  { %v1250_v50 = vmul.f32 0.2, %v1056_v7  ;;  %3155 = vmatprep.mubr.msk.f32.mxu0 %vm729_vm3, %v1295_v32  ;;  %vm1202_vm1 = vcmp.ge.f32.partialorder %v1056_v7, 0.0 }
 0x1e8   :  { %vm1201_vm2 = vcmp.ge.f32.partialorder %v1051_v49, 0.0  ;;  %v1249_v19 = vmul.f32 0.2, %v1051_v49  ;;  %v3083_v53 = vpop.f32.mrb[38].mxu1  ;;  %3156 = vmatmul.mubr.msk.f32.gmra.mrb[54].mxu0 %vm729_vm3, %v1296_v51 }
 0x1e9   :  { %v1066_v54 = vadd.f32 %v3083_v53, %v3814_v18  ;;  %v1060_v29 = vpop.f32.mrb[39].mxu1  ;;  %v1298_v59 = vsel %vm1202_vm1, %v1056_v7, %v1250_v50 }
 0x1ea   :  { %v1061_v55 = vadd.f32 %v3814_v18, %v1060_v29  ;;  %v1297_v56 = vsel %vm1201_vm2, %v1051_v49, %v1249_v19 }
 0x1eb   :  { %v1252_v42 = vmul.f32 0.2, %v1066_v54  ;;  %3158 = vmatprep.mubr.msk.f32.mxu0 %vm729_vm3, %v1297_v56  ;;  %vm1204_vm4 = vcmp.ge.f32.partialorder %v1066_v54, 0.0 }
 0x1ec   :  { %vm1203_vm5 = vcmp.ge.f32.partialorder %v1061_v55, 0.0  ;;  %v1251_v60 = vmul.f32 0.2, %v1061_v55  ;;  %v3086_v61 = vpop.f32.mrb[40].mxu1  ;;  %3159 = vmatmul.mubr.msk.f32.gmra.mrb[56].mxu0 %vm729_vm3, %v1298_v59 }
 0x1ed   :  { %v1076_v37 = vadd.f32 %v3086_v61, %v3814_v18  ;;  %v1070_v62 = vpop.f32.mrb[41].mxu1  ;;  %v1300_v2 = vsel %vm1204_vm4, %v1066_v54, %v1252_v42 }
 0x1ee   :  { %v1071_v52 = vadd.f32 %v3814_v18, %v1070_v62  ;;  %v1299_v0 = vsel %vm1203_vm5, %v1061_v55, %v1251_v60 }
 0x1ef   :  { %v1254_v1 = vmul.f32 0.2, %v1076_v37  ;;  %3161 = vmatprep.mubr.msk.f32.mxu0 %vm729_vm3, %v1299_v0  ;;  %vm1206_vm6 = vcmp.ge.f32.partialorder %v1076_v37, 0.0 }
 0x1f0   :  { %vm1205_vm7 = vcmp.ge.f32.partialorder %v1071_v52, 0.0  ;;  %v1253_v47 = vmul.f32 0.2, %v1071_v52  ;;  %v3089_v3 = vpop.f32.mrb[42].mxu1  ;;  %3162 = vmatmul.mubr.msk.f32.gmra.mrb[58].mxu0 %vm729_vm3, %v1300_v2 }
 0x1f1   :  { %v1086_v63 = vadd.f32 %v3089_v3, %v3814_v18  ;;  %v1080_v5 = vpop.f32.mrb[43].mxu1  ;;  %v1302_v9 = vsel %vm1206_vm6, %v1076_v37, %v1254_v1 }
 0x1f2   :  { %v1081_v6 = vadd.f32 %v3814_v18, %v1080_v5  ;;  %v1301_v58 = vsel %vm1205_vm7, %v1071_v52, %v1253_v47 }
 0x1f3   :  { %v1256_v8 = vmul.f32 0.2, %v1086_v63  ;;  %3164 = vmatprep.mubr.msk.f32.mxu0 %vm729_vm3, %v1301_v58  ;;  %vm1208_vm8 = vcmp.ge.f32.partialorder %v1086_v63, 0.0 }
 0x1f4   :  { %vm1207_vm9 = vcmp.ge.f32.partialorder %v1081_v6, 0.0  ;;  %v1255_v11 = vmul.f32 0.2, %v1081_v6  ;;  %v3092_v12 = vpop.f32.mrb[44].mxu1  ;;  %3165 = vmatmul.mubr.msk.f32.gmra.mrb[60].mxu0 %vm729_vm3, %v1302_v9 }
 0x1f5   :  { %v1096_v13 = vadd.f32 %v3092_v12, %v3814_v18  ;;  %v1090_v14 = vpop.f32.mrb[45].mxu1  ;;  %v1304_v16 = vsel %vm1208_vm8, %v1086_v63, %v1256_v8 }
 0x1f6   :  { %v1091_v15 = vadd.f32 %v3814_v18, %v1090_v14  ;;  %v1303_v57 = vsel %vm1207_vm9, %v1081_v6, %v1255_v11 }
 0x1f7   :  { %v1258_v4 = vmul.f32 0.2, %v1096_v13  ;;  %3167 = vmatprep.mubr.msk.f32.mxu0 %vm729_vm3, %v1303_v57  ;;  %vm1210_vm10 = vcmp.ge.f32.partialorder %v1096_v13, 0.0 }
 0x1f8   :  { %vm1209_vm11 = vcmp.ge.f32.partialorder %v1091_v15, 0.0  ;;  %v1257_v17 = vmul.f32 0.2, %v1091_v15  ;;  %3168 = vmatmul.mubr.msk.f32.gmra.mrb[62].mxu0 %vm729_vm3, %v1304_v16  ;;  %v3095_v20 = vpop.f32.mrb[46].mxu1 }
 0x1f9   :  { %v1106_v21 = vadd.f32 %v3095_v20, %v3814_v18  ;;  %v1100_v23 = vpop.f32.mrb[47].mxu1  ;;  %v1306_v26 = vsel %vm1210_vm10, %v1096_v13, %v1258_v4 }
 0x1fa   :  { %v1305_v24 = vsel %vm1209_vm11, %v1091_v15, %v1257_v17  ;;  %v1101_v25 = vadd.f32 %v3814_v18, %v1100_v23 }
 0x1fb   :  { %3170 = vmatprep.mubr.msk.f32.mxu0 %vm729_vm3, %v1305_v24  ;;  %v1260_v27 = vmul.f32 0.2, %v1106_v21  ;;  %vm1212_vm12 = vcmp.ge.f32.partialorder %v1106_v21, 0.0  ;;  %v1778_v24 = vlaneseq }
 0x1fc   :  { %3171 = vmatmul.mubr.msk.f32.gmra.mrb[64].mxu0 %vm729_vm3, %v1306_v26  ;;  %vm1211_vm13 = vcmp.ge.f32.partialorder %v1101_v25, 0.0  ;;  %v1259_v28 = vmul.f32 0.2, %v1101_v25  ;;  %v3098_v30 = vpop.f32.mrb[48].mxu1  ;;  %v108_v26 = vld [vmem:[%s4068_s1] sm:$0x7] }
 0x1fd   :  { %v1116_v31 = vadd.f32 %v3098_v30, %v3814_v18  ;;  %v1110_v33 = vpop.f32.mrb[49].mxu1  ;;  %v1308_v36 = vsel %vm1212_vm12, %v1106_v21, %v1260_v27 }
 0x1fe   :  { %v1111_v34 = vadd.f32 %v3814_v18, %v1110_v33  ;;  %v1307_v10 = vsel %vm1211_vm13, %v1101_v25, %v1259_v28  ;;  %v3912_v25 = vshrl.u32 %v1778_v24, 7 }
 0x1ff   :  { %v1262_v35 = vmul.f32 0.2, %v1116_v31  ;;  %3173 = vmatprep.mubr.msk.f32.mxu0 %vm729_vm3, %v1307_v10  ;;  %vm1214_vm14 = vcmp.ge.f32.partialorder %v1116_v31, 0.0  ;;  %v3356_v10 = vmov 0.0  }
 0x200   :  { %vm1213_vm15 = vcmp.ge.f32.partialorder %v1111_v34, 0.0  ;;  %v1261_v38 = vmul.f32 0.2, %v1111_v34  ;;  %v3101_v39 = vpop.f32.mrb[50].mxu1  ;;  %3174 = vmatmul.mubr.msk.f32.gmra.mrb[66].mxu0 %vm729_vm3, %v1308_v36  ;;  %v2070_v27 = vsub.s32 0, %v3912_v25  ;;  %v2078_v33 = vsub.s32 2, %v3912_v25 }
 0x201   :  { %v1126_v40 = vadd.f32 %v3101_v39, %v3814_v18  ;;  %v1120_v41 = vpop.f32.mrb[51].mxu1  ;;  %v1310_v45 = vsel %vm1214_vm14, %v1116_v31, %v1262_v35  ;;  %v3355_v31 = vmov 1.0   ;;  %59 = vst.msk [vmem:[#allocation2] sm:$0xff] %vm58_vm0, %v3356_v10  ;;  %v3935_v35 = vld [vmem:[%s4074_s7] ss:$0 sm:$0xff] }
 0x202   :  { %v1121_v43 = vadd.f32 %v3814_v18, %v1120_v41  ;;  %v1309_v44 = vsel %vm1213_vm15, %v1111_v34, %v1261_v38  ;;  %v3919_v30 = vrot.slane %v108_v26, %v2070_v27  ;;  %v3926_v34 = vrot.slane %v108_v26, %v2078_v33 }
 0x203   :  { %v1264_v22 = vmul.f32 0.2, %v1126_v40  ;;  %3176 = vmatprep.mubr.msk.f32.mxu0 %vm729_vm3, %v1309_v44  ;;  %vm1216_vm1 = vcmp.ge.f32.partialorder %v1126_v40, 0.0 }
 0x204   :  { %vm1215_vm2 = vcmp.ge.f32.partialorder %v1121_v43, 0.0  ;;  %v1263_v46 = vmul.f32 0.2, %v1121_v43  ;;  %3177 = vmatmul.mubr.msk.f32.gmra.mrb[68].mxu0 %vm729_vm3, %v1310_v45  ;;  %v3104_v7 = vpop.f32.mrb[52].mxu1  ;;  %vm2080_vm15 = vcmp.eq.s32.totalorder %v3912_v25, %v3919_v30 }
 0x205   :  { %v1136_v48 = vadd.f32 %v3104_v7, %v3814_v18  ;;  %v1130_v49 = vpop.f32.mrb[53].mxu1  ;;  %v1312_v51 = vsel %vm1216_vm1, %v1126_v40, %v1264_v22  ;;  %vm2082_vm1 = vcmp.eq.s32.totalorder %v3912_v25, %v3926_v34 }
 0x206   :  { %v1311_v32 = vsel %vm1215_vm2, %v1121_v43, %v1263_v46  ;;  %v1131_v50 = vadd.f32 %v3814_v18, %v1130_v49  ;;  %vm3358_vm2 = vmmov 0  }
 0x207   :  { %3179 = vmatprep.mubr.msk.f32.mxu0 %vm729_vm3, %v1311_v32  ;;  %vm1218_vm4 = vcmp.ge.f32.partialorder %v1136_v48, 0.0  ;;  %v1266_v19 = vmul.f32 0.2, %v1136_v48 }
 0x208   :  { %3180 = vmatmul.mubr.msk.f32.gmra.mrb[70].mxu0 %vm729_vm3, %v1312_v51  ;;  %vm1217_vm5 = vcmp.ge.f32.partialorder %v1131_v50, 0.0  ;;  %v1265_v53 = vmul.f32 0.2, %v1131_v50  ;;  %v3107_v54 = vpop.f32.mrb[54].mxu1 }
 0x209   :  { %v1146_v29 = vadd.f32 %v3107_v54, %v3814_v18  ;;  %v1140_v55 = vpop.f32.mrb[55].mxu1  ;;  %v1314_v56 = vsel %vm1218_vm4, %v1136_v48, %v1266_v19 }
 0x20a   :  { %v1141_v42 = vadd.f32 %v3814_v18, %v1140_v55  ;;  %v1313_v59 = vsel %vm1217_vm5, %v1131_v50, %v1265_v53  ;;  %vm3359_vm5 = vmmov 1  }
 0x20b   :  { %vm1220_vm6 = vcmp.ge.f32.partialorder %v1146_v29, 0.0  ;;  %v1268_v60 = vmul.f32 0.2, %v1146_v29  ;;  %3182 = vmatprep.mubr.msk.f32.mxu0 %vm729_vm3, %v1313_v59 }
 0x20c   :  { %vm1219_vm7 = vcmp.ge.f32.partialorder %v1141_v42, 0.0  ;;  %v1267_v61 = vmul.f32 0.2, %v1141_v42  ;;  %v3110_v37 = vpop.f32.mrb[56].mxu1  ;;  %3183 = vmatmul.mubr.msk.f32.gmra.mrb[72].mxu0 %vm729_vm3, %v1314_v56 }
 0x20d   :  { %v1156_v62 = vadd.f32 %v3110_v37, %v3814_v18  ;;  %v1150_v52 = vpop.f32.mrb[57].mxu1  ;;  %v1316_v0 = vsel %vm1220_vm6, %v1146_v29, %v1268_v60 }
 0x20e   :  { %v1151_v1 = vadd.f32 %v3814_v18, %v1150_v52  ;;  %v1315_v2 = vsel %vm1219_vm7, %v1141_v42, %v1267_v61  ;;  %vm2255_vm7 = vcmask 1043456  }
 0x20f   :  { %vm1222_vm8 = vcmp.ge.f32.partialorder %v1156_v62, 0.0  ;;  %v1270_v47 = vmul.f32 0.2, %v1156_v62  ;;  %3185 = vmatprep.mubr.msk.f32.mxu0 %vm729_vm3, %v1315_v2 }
 0x210   :  { %vm1221_vm9 = vcmp.ge.f32.partialorder %v1151_v1, 0.0  ;;  %v1269_v3 = vmul.f32 0.2, %v1151_v1  ;;  %v3113_v63 = vpop.f32.mrb[58].mxu1  ;;  %3186 = vmatmul.mubr.msk.f32.gmra.mrb[74].mxu0 %vm729_vm3, %v1316_v0 }
 0x211   :  { %v1166_v5 = vadd.f32 %v3113_v63, %v3814_v18  ;;  %v1160_v6 = vpop.f32.mrb[59].mxu1  ;;  %v1318_v58 = vsel %vm1222_vm8, %v1156_v62, %v1270_v47  ;;  %vm2251_vm8 = vcmask 31744  }
 0x212   :  { %v1161_v8 = vadd.f32 %v3814_v18, %v1160_v6  ;;  %v1317_v9 = vsel %vm1221_vm9, %v1151_v1, %v1269_v3 }
 0x213   :  { %vm1224_vm10 = vcmp.ge.f32.partialorder %v1166_v5, 0.0  ;;  %v1272_v11 = vmul.f32 0.2, %v1166_v5  ;;  %3188 = vmatprep.mubr.msk.f32.mxu0 %vm729_vm3, %v1317_v9 }
 0x214   :  { %vm1223_vm11 = vcmp.ge.f32.partialorder %v1161_v8, 0.0  ;;  %v1271_v12 = vmul.f32 0.2, %v1161_v8  ;;  %v3116_v13 = vpop.f32.mrb[60].mxu1  ;;  %3189 = vmatmul.mubr.msk.f32.gmra.mrb[76].mxu0 %vm729_vm3, %v1318_v58 }
 0x215   :  { %v1176_v14 = vadd.f32 %v3116_v13, %v3814_v18  ;;  %v1170_v15 = vpop.f32.mrb[61].mxu1  ;;  %v1320_v57 = vsel %vm1224_vm10, %v1166_v5, %v1272_v11 }
 0x216   :  { %v1171_v4 = vadd.f32 %v3814_v18, %v1170_v15  ;;  %v1319_v16 = vsel %vm1223_vm11, %v1161_v8, %v1271_v12  ;;  %v2074_v18 = vsub.s32 1, %v3912_v25 }
 0x217   :  { %vm1226_vm12 = vcmp.ge.f32.partialorder %v1176_v14, 0.0  ;;  %v1274_v17 = vmul.f32 0.2, %v1176_v14  ;;  %3191 = vmatprep.mubr.msk.f32.mxu0 %vm729_vm3, %v1319_v16 }
 0x218   :  { %vm1225_vm13 = vcmp.ge.f32.partialorder %v1171_v4, 0.0  ;;  %v1273_v20 = vmul.f32 0.2, %v1171_v4  ;;  %3192 = vmatmul.mubr.msk.f32.gmra.mrb[78].mxu0 %vm729_vm3, %v1320_v57  ;;  %v2075_v28 = vrot.slane %v108_v26, %v2074_v18 }
 0x219   :  { %v1322_v21 = vsel %vm1226_vm12, %v1176_v14, %v1274_v17 }
 0x21a   :  { %v1321_v23 = vsel %vm1225_vm13, %v1171_v4, %v1273_v20  ;;  %vm2081_vm14 = vcmp.eq.s32.totalorder %v3912_v25, %v2075_v28 }
 0x21b   :  { %3194 = vmatprep.mubr.msk.f32.mxu0 %vm729_vm3, %v1321_v23  ;;  %2738 = vmatprep.mubr.msk.f32.mxu1 %vm2081_vm14, %v3355_v31 }
 0x21c   :  { %3195 = vmatmul.mubr.msk.f32.gmra.mrb[80].mxu0 %vm729_vm3, %v1322_v21 }
 0x293   :  { %v3127_v36 = vpop.f32.mrb[34].mxu0 }
 0x294   :  { %v1545_v38 = vadd.f32 %v3127_v36, %v3935_v35  ;;  %v1539_v39 = vpop.f32.mrb[35].mxu0 }
 0x295   :  { %v1540_v40 = vadd.f32 %v3935_v35, %v1539_v39 }
 0x297   :  { %v3268_v41 = vpack.c.bf16 %v1545_v38, %v1540_v40  ;;  %v3130_v43 = vpop.f32.mrb[36].mxu0 }
 0x298   :  { %v1555_v44 = vadd.f32 %v3130_v43, %v3935_v35  ;;  %v1549_v22 = vpop.f32.mrb[37].mxu0 }
 0x299   :  { %v1550_v45 = vadd.f32 %v3935_v35, %v1549_v22 }
 0x29b   :  { %v3272_v46 = vpack.c.bf16 %v1555_v44, %v1550_v45  ;;  %v3133_v7 = vpop.f32.mrb[38].mxu0 }
 0x29c   :  { %v1565_v48 = vadd.f32 %v3133_v7, %v3935_v35  ;;  %v1559_v49 = vpop.f32.mrb[39].mxu0 }
 0x29d   :  { %v1560_v32 = vadd.f32 %v3935_v35, %v1559_v49 }
 0x29f   :  { %v3276_v50 = vpack.c.bf16 %v1565_v48, %v1560_v32  ;;  %v3136_v51 = vpop.f32.mrb[40].mxu0 }
 0x2a0   :  { %v1575_v19 = vadd.f32 %v3136_v51, %v3935_v35  ;;  %v1569_v53 = vpop.f32.mrb[41].mxu0 }
 0x2a1   :  { %v1570_v54 = vadd.f32 %v3935_v35, %v1569_v53 }
 0x2a3   :  { %v3280_v29 = vpack.c.bf16 %v1575_v19, %v1570_v54  ;;  %v3139_v55 = vpop.f32.mrb[42].mxu0 }
 0x2a4   :  { %v1585_v56 = vadd.f32 %v3139_v55, %v3935_v35  ;;  %v1579_v42 = vpop.f32.mrb[43].mxu0 }
 0x2a5   :  { %v1580_v59 = vadd.f32 %v3935_v35, %v1579_v42 }
 0x2a7   :  { %v3284_v60 = vpack.c.bf16 %v1585_v56, %v1580_v59  ;;  %v3142_v61 = vpop.f32.mrb[44].mxu0 }
 0x2a8   :  { %v1595_v37 = vadd.f32 %v3142_v61, %v3935_v35  ;;  %v1589_v62 = vpop.f32.mrb[45].mxu0 }
 0x2a9   :  { %v1590_v52 = vadd.f32 %v3935_v35, %v1589_v62 }
 0x2ab   :  { %v3288_v0 = vpack.c.bf16 %v1595_v37, %v1590_v52  ;;  %v3145_v1 = vpop.f32.mrb[46].mxu0  ;;  %v3357_v52 = vmov 0.0|0.0  }
 0x2ac   :  { %v1605_v2 = vadd.f32 %v3145_v1, %v3935_v35  ;;  %v1599_v47 = vpop.f32.mrb[47].mxu0 }
 0x2ad   :  { %v1600_v3 = vadd.f32 %v3935_v35, %v1599_v47 }
 0x2af   :  { %v3292_v63 = vpack.c.bf16 %v1605_v2, %v1600_v3  ;;  %v3148_v5 = vpop.f32.mrb[48].mxu0  ;;  %v1816_v2 = vadd.s32 296, %v3912_v25  ;;  %v2237_v25 = vld [vmem:[%s4076_s9] sm:$0xff] }
 0x2b0   :  { %v3952_v6 = vadd.f32 %v3148_v5, %v3935_v35  ;;  %v1609_v58 = vpop.f32.mrb[49].mxu0 }
 0x2b1   :  { %v1610_v8 = vadd.f32 %v3935_v35, %v1609_v58  ;;  %vm1913_vm4 = vcmp.lt.s32.totalorder %v1816_v2, 300 }
 0x2b2   :  { %vm3306_vm6 = vmpackc.low %vm1913_vm4, %vm3359_vm5 }
 0x2b3   :  { %v3296_v9 = vpack.c.bf16 %v3952_v6, %v1610_v8  ;;  %v3151_v11 = vpop.f32.mrb[50].mxu0 }
 0x2b4   :  { %v1625_v12 = vadd.f32 %v3151_v11, %v3935_v35  ;;  %v1619_v13 = vpop.f32.mrb[51].mxu0 }
 0x2b5   :  { %v1620_v14 = vadd.f32 %v3935_v35, %v1619_v13 }
 0x2b7   :  { %v3266_v15 = vpack.c.bf16 %v1625_v12, %v1620_v14  ;;  %v3154_v57 = vpop.f32.mrb[52].mxu0 }
 0x2b8   :  { %v1635_v4 = vadd.f32 %v3154_v57, %v3935_v35  ;;  %v1629_v16 = vpop.f32.mrb[53].mxu0 }
 0x2b9   :  { %v1630_v17 = vadd.f32 %v3935_v35, %v1629_v16  ;;  %3267 = vmatprep.subr.bf16.mxu1 %v3266_v15  ;;  %v2239_v16 = vld [vmem:[%s4077_s10] sm:$0xf] }
 0x2ba   :  { %3269 = vmatpush3.bf16.msra.mxu1 %v3268_v41 }
 0x2bb   :  { %v3270_v20 = vpack.c.bf16 %v1635_v4, %v1630_v17  ;;  %v3157_v21 = vpop.f32.mrb[54].mxu0  ;;  %v2236_v17 = vld [vmem:[%s4075_s8] sm:$0xff] }
 0x2bc   :  { %v1645_v23 = vadd.f32 %v3157_v21, %v3935_v35  ;;  %v1639_v24 = vpop.f32.mrb[55].mxu0 }
 0x2bd   :  { %v1640_v18 = vadd.f32 %v3935_v35, %v1639_v24  ;;  %3271 = vmatprep.subr.bf16.mxu1 %v3270_v20  ;;  %v2083_v24 = vld [vmem:[#allocation2] sm:$0xff] }
 0x2be   :  { %3273 = vmatpush3.bf16.msra.mxu1 %v3272_v46 }
 0x2bf   :  { %v3274_v26 = vpack.c.bf16 %v1645_v23, %v1640_v18  ;;  %v3160_v27 = vpop.f32.mrb[56].mxu0 }
 0x2c0   :  { %v1655_v28 = vadd.f32 %v3160_v27, %v3935_v35  ;;  %v1649_v33 = vpop.f32.mrb[57].mxu0 }
 0x2c1   :  { %v1650_v36 = vadd.f32 %v3935_v35, %v1649_v33  ;;  %3275 = vmatprep.subr.bf16.mxu1 %v3274_v26 }
 0x2c2   :  { %3277 = vmatpush3.bf16.msra.mxu1 %v3276_v50 }
 0x2c3   :  { %v3278_v38 = vpack.c.bf16 %v1655_v28, %v1650_v36  ;;  %v3163_v39 = vpop.f32.mrb[58].mxu0 }
 0x2c4   :  { %v1665_v40 = vadd.f32 %v3163_v39, %v3935_v35  ;;  %v1659_v41 = vpop.f32.mrb[59].mxu0  ;;  %v2241_v39 = vld [vmem:[%s4079_s12] sm:$0xff] }
 0x2c5   :  { %v1660_v43 = vadd.f32 %v3935_v35, %v1659_v41  ;;  %3279 = vmatprep.subr.bf16.mxu1 %v3278_v38 }
 0x2c6   :  { %3281 = vmatpush3.bf16.msra.mxu1 %v3280_v29 }
 0x2c7   :  { %v3282_v44 = vpack.c.bf16 %v1665_v40, %v1660_v43  ;;  %v3166_v22 = vpop.f32.mrb[60].mxu0  ;;  %v2242_v40 = vld [vmem:[%s4079_s12 + $0x8] sm:$0xff]  ;;  %v2243_v43 = vld [vmem:[%s4079_s12 + $0x10] sm:$0xff] }
 0x2c8   :  { %v1675_v45 = vadd.f32 %v3166_v22, %v3935_v35  ;;  %v1669_v46 = vpop.f32.mrb[61].mxu0  ;;  %v3312_v41 = vpack.c.bf16 %v2242_v40, %v2241_v39 }
 0x2c9   :  { %v1670_v7 = vadd.f32 %v3935_v35, %v1669_v46  ;;  %3283 = vmatprep.subr.bf16.mxu1 %v3282_v44  ;;  %v2244_v44 = vld [vmem:[%s4079_s12 + $0x18] sm:$0xff] }
 0x2ca   :  { %3285 = vmatpush3.bf16.msra.mxu1 %v3284_v60  ;;  %v3315_v22 = vpack.c.bf16 %v2244_v44, %v2243_v43 }
 0x2cb   :  { %v3286_v48 = vpack.c.bf16 %v1675_v45, %v1670_v7  ;;  %v3169_v49 = vpop.f32.mrb[62].mxu0  ;;  %v2745_v45 = vld [vmem:[%s4078_s11] ss:$0 sm:$0xff] }
 0x2cc   :  { %v1685_v32 = vadd.f32 %v3169_v49, %v3935_v35  ;;  %v1679_v50 = vpop.f32.mrb[63].mxu0  ;;  %v2246_v49 = vld [vmem:[%s4081_s14] sm:$0xff] }
 0x2cd   :  { %v1680_v51 = vadd.f32 %v3935_v35, %v1679_v50  ;;  %3287 = vmatprep.subr.bf16.mxu1 %v3286_v48 }
 0x2ce   :  { %3289 = vmatpush3.bf16.msra.mxu1 %v3288_v0 }
 0x2cf   :  { %v3290_v19 = vpack.c.bf16 %v1685_v32, %v1680_v51  ;;  %v3172_v53 = vpop.f32.mrb[64].mxu0  ;;  %v2247_v32 = vld [vmem:[%s4081_s14 + $0x8] sm:$0xff] }
 0x2d0   :  { %v1695_v54 = vadd.f32 %v3172_v53, %v3935_v35  ;;  %v1689_v29 = vpop.f32.mrb[65].mxu0 }
 0x2d1   :  { %v1690_v55 = vadd.f32 %v3935_v35, %v1689_v29  ;;  %3291 = vmatprep.subr.bf16.mxu1 %v3290_v19  ;;  %v3318_v19 = vpack.c.bf16 %v2247_v32, %v2246_v49  ;;  %v2249_v29 = vld [vmem:[%s4081_s14 + $0x18] sm:$0xff] }
 0x2d2   :  { %3293 = vmatpush3.bf16.msra.mxu1 %v3292_v63 }
 0x2d3   :  { %v3294_v56 = vpack.c.bf16 %v1695_v54, %v1690_v55  ;;  %v3175_v42 = vpop.f32.mrb[66].mxu0  ;;  %v2248_v54 = vld [vmem:[%s4081_s14 + $0x10] sm:$0xff]  ;;  %s2580_s14 = sshll.u32 %s3360_s21, 4  ;;  %s2581_s14 = int_to_ptr.vmem [resolvable:$true] %s2580_s14 }
 0x2d4   :  { %v1705_v59 = vadd.f32 %v3175_v42, %v3935_v35  ;;  %v1699_v60 = vpop.f32.mrb[67].mxu0  ;;  %v3321_v55 = vpack.c.bf16 %v2249_v29, %v2248_v54  ;;  %p3336_p1 = scmp.lt.s32.totalorder %s2581_s14, %s2581_s14 }
 0x2d5   :  { %3295 = vmatprep.subr.bf16.mxu1 %v3294_v56  ;;  %v1700_v61 = vadd.f32 %v3935_v35, %v1699_v60  ;;  %v2746_v56 = vld [vmem:[%s4080_s13] ss:$0 sm:$0xff]  ;;  %s3331_s13 = scalar_lea.vmem %s2581_s14, 128 }
 0x2d6   :  { %3297 = vmatpush3.bf16.msra.mxu1 %v3296_v9  ;;  %p3332_p0 = scmp.ne.s32.totalorder %s2581_s14, %s3331_s13  ;;  %p3337_p2 = scmp.lt.s32.totalorder %s3331_s13, %s3331_s13 }
 0x2d7   :  { %v3299_v37 = vpack.c.bf16 %v1705_v59, %v1700_v61  ;;  %v3178_v62 = vpop.f32.mrb[68].mxu0  ;;  %3298 = vmatprep.subr.bf16.mxu1 %v3357_v52 }
 0x2d8   :  { %v1715_v0 = vadd.f32 %v3178_v62, %v3935_v35  ;;  %v1709_v1 = vpop.f32.mrb[69].mxu0  ;;  %p3338_p3 = por %p3337_p2, %p3336_p1 }
 0x2d9   :  { %v1710_v47 = vadd.f32 %v3935_v35, %v1709_v1  ;;  %2739 = vmatmul.mubr.msk.f32.vlgmr.msra.gmra.mrb[62].mxu1 %vm2080_vm15, %v3355_v31 }
 0x2da   :  { %3300 = vmatpush3.bf16.msra.mxu1 %v3299_v37  ;;  %3209 = vmatprep.mubr.msk.f32.mxu1 %vm3358_vm2, %v3356_v10  ;;  %v2748_v37 = vld [vmem:[%s4082_s15] ss:$0 sm:$0xff]  ;;  %p3339_p4 = pnand %p3338_p3, %p3332_p0 }
 0x2db   :  { %v3302_v3 = vpack.c.bf16 %v1715_v0, %v1710_v47  ;;  %v3181_v63 = vpop.f32.mrb[70].mxu0  ;;  %3301 = vmatprep.subr.bf16.mxu1 %v3357_v52 }
 0x2dc   :  { %v1725_v5 = vadd.f32 %v3181_v63, %v3935_v35  ;;  %v1719_v6 = vpop.f32.mrb[71].mxu0 }
 0x2dd   :  { %v1720_v58 = vadd.f32 %v3935_v35, %v1719_v6 }
 0x2de   :  { %3303 = vmatpush3.bf16.msra.mxu1 %v3302_v3 }
 0x2df   :  { %v3305_v8 = vpack.c.bf16 %v1725_v5, %v1720_v58  ;;  %3304 = vmatprep.subr.bf16.mxu1 %v3357_v52  ;;  %v3184_v30 = vpop.f32.mrb[72].mxu0 }
 0x2e0   :  { %v1729_v9 = vpop.f32.mrb[73].mxu0 }
 0x2e2   :  { %3307 = vmatpush3.bf16.msk.msra.mxu1 %vm3306_vm6, %v3305_v8 }
 0x2e3   :  { %v3187_v11 = vpop.f32.mrb[74].mxu0  ;;  %3212 = vmatprep.subr.mxu1 %v3356_v10 }
 0x2e4   :  { %v1739_v12 = vpop.f32.mrb[75].mxu0 }
 0x2e5   :  { %3210 = vmatmul.mubr.msk.f32.vlgmr.msra.gmra.mrb[64].mxu1 %vm2082_vm1, %v3355_v31  ;;  %v2238_v31 = vld [vmem:[%s4076_s9 + $0x8] sm:$0xff] }
 0x2e6   :  { %3214 = vmatprep.mubr.msk.f32.mxu1 %vm3358_vm2, %v3356_v10  ;;  %3213 = vmatpush3.msk.msra.mxu1 %vm2255_vm7, %v2239_v16  ;;  %v3309_v34 = vpack.c.bf16 %v2238_v31, %v2237_v25 }
 0x2e7   :  { %v3190_v35 = vpop.f32.mrb[76].mxu0  ;;  %3308 = vmatprep.subr.bf16.mxu1 %v3357_v52 }
 0x2e8   :  { %v1749_v13 = vpop.f32.mrb[77].mxu0 }
 0x2e9   :  { %3215 = vmatmul.mubr.msk.f32.vlgmr.msra.gmra.mrb[66].mxu1 %vm2251_vm8, %v2236_v17 }
 0x2ea   :  { %3221 = vmatprep.mubr.msk.f32.mxu1 %vm3358_vm2, %v3356_v10  ;;  %3310 = vmatpush3.bf16.msra.mxu1 %v3309_v34 }
 0x2eb   :  { %v3193_v14 = vpop.f32.mrb[78].mxu0  ;;  %3311 = vmatprep.subr.bf16.mxu1 %v3357_v52 }
 0x2ec   :  { %v1759_v15 = vpop.f32.mrb[79].mxu0 }
 0x2ef   :  { %v3196_v57 = vpop.f32.mrb[80].mxu0 }
 0x2f0   :  { %v1769_v4 = vpop.f32.mrb[81].mxu0 }
 0x3ac   :  { %v2936_v20 = vpop.f32.mrb[62].mxu1 }
 0x3ad   :  { %v2937_v21 = vpop.f32.mrb[63].mxu1 }
 0x3ae   :  { %v2938_v23 = vadd.f32 %v2937_v21, %v2936_v20 }
 0x3b8   :  { %v2226_v18 = vpop.f32.mrb[64].mxu1 }
 0x3b9   :  { %v2227_v26 = vadd.f32 %v2938_v23, %v2226_v18  ;;  %v3211_v27 = vpop.f32.mrb[65].mxu1 }
 0x3bb   :  { %v2230_v28 = vadd.f32 %v2227_v26, %v2083_v24 }
 0x3bc   :  { %v2325_v36 = vpop.f32.mrb[66].mxu1 }
 0x3bd   :  { %2231 = vst.msk [vmem:[#allocation2] sm:$0xff] %vm58_vm0, %v2230_v28  ;;  %v3216_v38 = vpop.f32.mrb[67].mxu1 }
 0x3c4   :  { %v2235_v33 = vld [vmem:[#allocation2] sm:$0xff] }
 0x3c5   :  { %3222 = vmatmul.mubr.msk.f32.vlgmr.msra.gmra.mrb[68].mxu1 %vm58_vm0, %v2235_v33 }
 0x3c6   :  { %3232 = vmatprep.mubr.msk.f32.mxu1 %vm3358_vm2, %v3356_v10  ;;  %3313 = vmatpush3.bf16.msra.mxu1 %v3312_v41 }
 0x3c7   :  { %3314 = vmatprep.subr.bf16.mxu1 %v3357_v52 }
 0x3ca   :  { %3316 = vmatpush3.bf16.msra.mxu1 %v3315_v22 }
 0x3cb   :  { %3317 = vmatprep.subr.bf16.mxu1 %v3357_v52 }
 0x498   :  { %v2398_v46 = vpop.f32.mrb[68].mxu1 }
 0x499   :  { %v2399_v7 = vadd.f32 %v2398_v46, %v2325_v36  ;;  %v3223_v48 = vpop.f32.mrb[69].mxu1 }
 0x49b   :  { %v2408_v50 = vadd.f32 %v2745_v45, %v2399_v7 }
 0x49d   :  { %vm2409_vm0 = vcmp.ge.f32.partialorder %v2408_v50, 0.0  ;;  %v2410_v51 = vmul.f32 0.2, %v2408_v50 }
 0x49f   :  { %v2411_v53 = vsel %vm2409_vm0, %v2408_v50, %v2410_v51 }
 0x4a0   :  { %3233 = vmatmul.mubr.msk.f32.vlgmr.msra.gmra.mrb[70].mxu1 %vm729_vm3, %v2411_v53 }
 0x4a1   :  { %3319 = vmatpush3.bf16.msra.mxu1 %v3318_v19  ;;  %3243 = vmatprep.mubr.msk.f32.mxu1 %vm3358_vm2, %v3356_v10 }
 0x4a2   :  { %3320 = vmatprep.subr.bf16.mxu1 %v3357_v52 }
 0x4a5   :  { %3322 = vmatpush3.bf16.msra.mxu1 %v3321_v55 }
 0x573   :  { %v2487_v42 = vpop.f32.mrb[70].mxu1 }
 0x574   :  { %v2488_v59 = vadd.f32 %v2746_v56, %v2487_v42  ;;  %v3234_v60 = vpop.f32.mrb[71].mxu1 }
 0x576   :  { %vm2491_vm9 = vcmp.ge.f32.partialorder %v2488_v59, 0.0  ;;  %v2492_v10 = vmul.f32 0.2, %v2488_v59 }
 0x578   :  { %v2493_v61 = vsel %vm2491_vm9, %v2488_v59, %v2492_v10 }
 0x579   :  { %3244 = vmatmul.mubr.msk.f32.vlgmr.msra.gmra.mrb[72].mxu1 %vm729_vm3, %v2493_v61 }
 0x64c   :  { %v2569_v62 = vpop.f32.mrb[72].mxu1 }
 0x64d   :  { %v2570_v52 = vadd.f32 %v2748_v37, %v2569_v62  ;;  %v3245_v0 = vpop.f32.mrb[73].mxu1 }
 0x64f   :  { %2573 = vst [vmem:[#allocation3] sm:$0xff] %v2570_v52 }
 0x650   :  { %3342 = shalt.err (!%p3339_p4)
}
 0x651   :  { %s3343_s27 = scalar_lea.hbm %s4083_s16, 128 }
 0x652   :  { %p3344_p5 = scmp.ne.s32.totalorder %s4083_s16, %s3343_s27  ;;  %p3347_p6 = scmp.lt.u32.totalorder %s3343_s27, %s4083_s16 }
 0x654   :  { %p3349_p7 = pnand %p3347_p6, %p3344_p5 }
 0x656   :  { %3352 = shalt.err (!%p3349_p7)
}
 0x657   :  { %2583 = dma.vmem_to_hbm [thread:$0]  %s2581_s14, 128, %s4083_s16, [#allocation4]  }
 0x658   :  { %3353 = dma.done.wait [#allocation4], 128  }
 0x659   :  { %3354 = vsyncadd [#allocation4], 4294967168 }
 0x65a   :  { %2587 = vsyncpa [#allocation4], 1 }

</bundles_post_ra>
